<compile_context>
chip_gen: v7x
topology: tpu7x:2x2x1
jax: 0.10.0
libtpu: 0.0.40
codegen_flags: <defaults>
</compile_context>

<pallas_src>
import numpy as np
import jax
import jax.numpy as jnp
from jax.experimental import pallas as pl
from jax.experimental.pallas import tpu as pltpu


# ---------------------------------------------------------------------------
# Autoregressive conv mask (sylvester-flows convention), OIHW to match weight.
# ---------------------------------------------------------------------------
def get_conv_ar_mask(kh, kw, n_in, n_out, zerodiagonal=False):
    assert n_out % n_in == 0 or n_in % n_out == 0
    l = (kh - 1) // 2
    m = (kw - 1) // 2
    mask = np.ones((n_out, n_in, kh, kw), dtype=np.float32)
    mask[:, :, :l, :] = 0.0
    mask[:, :, l, :m] = 0.0
    if n_out >= n_in:
        k = n_out // n_in
        for i in range(n_in):
            mask[i * k:(i + 1) * k, i + 1:, l, m] = 0.0
            if zerodiagonal:
                mask[i * k:(i + 1) * k, i:i + 1, l, m] = 0.0
    else:
        k = n_in // n_out
        for i in range(n_out):
            mask[i:i + 1, (i + 1) * k:, l, m] = 0.0
            if zerodiagonal:
                mask[i:i + 1, i * k:(i + 1) * k, l, m] = 0.0
    return jnp.asarray(mask)


# ---------------------------------------------------------------------------
# Fused Pallas kernel
# ---------------------------------------------------------------------------
_TAPS = tuple((dy, dx) for dy in range(3) for dx in range(3))


def _elu(x):
    return jnp.where(x > 0, x, jnp.exp(jnp.minimum(x, 0.0)) - 1.0)


def _tap_masks(H, W):
    """(9, H*W) f32 0/1 masks: valid iff (h+dy-1, w+dx-1) lies inside the image."""
    M = H * W
    masks = np.zeros((9, M), np.float32)
    for t, (dy, dx) in enumerate(_TAPS):
        hh = np.arange(H)[:, None] + (dy - 1)
        ww = np.arange(W)[None, :] + (dx - 1)
        valid = (hh >= 0) & (hh < H) & (ww >= 0) & (ww < W)
        masks[t] = valid.reshape(M).astype(np.float32)
    return jnp.asarray(masks)


def _build_kernel(H, W, n_hidden):
    M = H * W

    def kernel(*refs):
        x_ref, ctx_ref, masks_ref = refs[:3]
        w_refs = refs[3:3 + n_hidden]
        wh_ref, o_ref, patch_ref = refs[3 + n_hidden:]

        masks = masks_ref[...]                       # (9, M) boundary masks

        def masked_conv(act, w_ref_l):
            # act: (Cin, M) channels on sublanes, flattened spatial on lanes.
            cin = act.shape[0]
            k = 9 * cin + 1
            for t, (dy, dx) in enumerate(_TAPS):
                if dy == 1 and dx == 1:
                    tap = act                        # centre tap: no shift, no boundary
                else:
                    off = (dy - 1) * W + (dx - 1)    # static spatial offset of this tap
                    shifted = pltpu.roll(act, shift=(-off) % M, axis=1)
                    tap = shifted * masks[t:t + 1, :]
                patch_ref[t * cin:(t + 1) * cin, :] = tap
            # constant-ones row folds the bias into the matmul
            patch_ref[9 * cin:k, :] = jnp.ones((1, M), jnp.float32)
            # single im2col matmul: (Cout, 9*Cin+1) @ (9*Cin+1, M) -> (Cout, M)
            return jnp.dot(w_ref_l[...], patch_ref[0:k, :],
                           preferred_element_type=jnp.float32)

        ctx = ctx_ref[0]                             # (Ch, M)
        act = x_ref[0]                               # (C0p, M)
        for l in range(n_hidden):
            act = _elu(masked_conv(act, w_refs[l]) + ctx)   # elu(conv(x) + context)
        # fused mean/std head: elu(conv(x)), both heads in one matmul
        o_ref[0] = _elu(masked_conv(act, wh_ref)).astype(o_ref.dtype)

    return kernel


# ---------------------------------------------------------------------------
# One-time parameter preparation: apply AR mask, flatten to (Cout, 9*Cin + 1)
# (bias folded as the trailing column), fuse mean/std heads along Cout.
# ---------------------------------------------------------------------------
def prepare_params(params):
    def flatten(w, b, m, cin_pad=None):
        cout, cin = w.shape[0], w.shape[1]
        wm = jnp.transpose((m * w).astype(jnp.float32), (0, 2, 3, 1))   # (Cout,3,3,Cin)
        if cin_pad is not None and cin_pad > cin:
            wm = jnp.pad(wm, ((0, 0), (0, 0), (0, 0), (0, cin_pad - cin)))
        wf = wm.reshape(cout, -1)                                       # (Cout, 9*Cinp)
        return jnp.concatenate([wf, b.reshape(cout, 1).astype(jnp.float32)], axis=1)

    w_hidden = []
    for i, (w, b, m) in enumerate(params["hidden"]):
        cin = w.shape[1]
        # pad the first layer's Cin up to a multiple of 8 so all sublane offsets in the
        # im2col scratch are tile-aligned (input gets matching zero channels).
        cin_pad = -(-cin // 8) * 8 if i == 0 else cin
        w_hidden.append(flatten(w, b, m, cin_pad))
    w_head = jnp.concatenate([flatten(*params["mean"]), flatten(*params["std"])], axis=0)
    return {"w_hidden": w_hidden, "w_head": w_head}


# ---------------------------------------------------------------------------
# Full module forward (single pallas_call) — matches AutoregressiveMultiConv2d.forward
# ---------------------------------------------------------------------------
def autoregressive_multi_conv2d(prepared, inputs_nchw, context_nchw):
    w_hidden = prepared["w_hidden"]
    w_head = prepared["w_head"]
    n_hidden = len(w_hidden)

    N, C0, H, W = inputs_nchw.shape
    Ch = context_nchw.shape[1]
    M = H * W
    cout2 = w_head.shape[0]
    cout = cout2 // 2
    c0_pad = (w_hidden[0].shape[1] - 1) // 9
    c_max = max((w.shape[1] - 1) // 9 for w in list(w_hidden) + [w_head])

    # NCHW -> (N, C, H*W): metadata-only reshapes, no transpose needed.
    x2 = inputs_nchw.reshape(N, C0, M).astype(jnp.float32)
    if c0_pad > C0:
        x2 = jnp.pad(x2, ((0, 0), (0, c0_pad - C0), (0, 0)))
    ctx2 = context_nchw.reshape(N, Ch, M).astype(jnp.float32)
    masks = _tap_masks(H, W)

    kernel = _build_kernel(H, W, n_hidden)

    in_specs = (
        [pl.BlockSpec((1, c0_pad, M), lambda n: (n, 0, 0)),
         pl.BlockSpec((1, Ch, M), lambda n: (n, 0, 0)),
         pl.BlockSpec((9, M), lambda n: (0, 0))]
        + [pl.BlockSpec(w.shape, lambda n: (0, 0)) for w in w_hidden]
        + [pl.BlockSpec(w_head.shape, lambda n: (0, 0))]
    )

    out = pl.pallas_call(
        kernel,
        grid=(N,),
        in_specs=in_specs,
        out_specs=pl.BlockSpec((1, cout2, M), lambda n: (n, 0, 0)),
        out_shape=jax.ShapeDtypeStruct((N, cout2, M), jnp.float32),
        scratch_shapes=[pltpu.VMEM((9 * c_max + 1, M), jnp.float32)],   # im2col patches
        compiler_params=pltpu.CompilerParams(dimension_semantics=("parallel",)),
    )(x2, ctx2, masks, *w_hidden, w_head)

    out = out.reshape(N, cout2, H, W)          # free reshape; already NCHW layout
    return out[:, :cout], out[:, cout:]


# ---------------------------------------------------------------------------
# Parameter init (deterministic, mimics nn.Conv2d default uniform init shapes)
# ---------------------------------------------------------------------------
def init_params(key, in_channels, out_channels, hidden_layers):
    def conv_params(key, cin, cout, zerodiag):
        k1, k2 = jax.random.split(key)
        bound = 1.0 / np.sqrt(cin * 3 * 3)
        w = jax.random.uniform(k1, (cout, cin, 3, 3), jnp.float32, -bound, bound)
        b = jax.random.uniform(k2, (cout,), jnp.float32, -bound, bound)
        m = get_conv_ar_mask(3, 3, cin, cout, zerodiagonal=zerodiag)
        return (w, b, m)

    params = {"hidden": []}
    layer_io = list(zip([in_channels] + hidden_layers[:-1], hidden_layers))
    keys = jax.random.split(key, len(layer_io) + 2)
    for k, (cin, cout) in zip(keys[:-2], layer_io):
        params["hidden"].append(conv_params(k, cin, cout, zerodiag=False))
    params["mean"] = conv_params(keys[-2], hidden_layers[-1], out_channels, zerodiag=True)
    params["std"] = conv_params(keys[-1], hidden_layers[-1], out_channels, zerodiag=True)
    return params


# ---------------------------------------------------------------------------
# Pure-JAX reference (for correctness check only)
# ---------------------------------------------------------------------------
def _ref_conv(x_nchw, w, b, mask):
    y = jax.lax.conv_general_dilated(
        x_nchw, mask * w, window_strides=(1, 1), padding=((1, 1), (1, 1)),
        dimension_numbers=("NCHW", "OIHW", "NCHW"))
    return y + b.reshape(1, -1, 1, 1)


def reference_forward(params, x, ctx):
    for (w, b, m) in params["hidden"]:
        x = jax.nn.elu(_ref_conv(x, w, b, m) + ctx)
    wm, bm, mm = params["mean"]
    ws, bs, ms = params["std"]
    return jax.nn.elu(_ref_conv(x, wm, bm, mm)), jax.nn.elu(_ref_conv(x, ws, bs, ms))


if __name__ == "__main__":
    key = jax.random.PRNGKey(0)
    in_channels, out_channels, hidden_layers = 4, 4, [32, 32]
    N, H, W = 2, 16, 16

    kp, kx, kc = jax.random.split(key, 3)
    params = init_params(kp, in_channels, out_channels, hidden_layers)
    x = jax.random.normal(kx, (N, in_channels, H, W), jnp.float32)
    ctx = jax.random.normal(kc, (N, hidden_layers[-1], H, W), jnp.float32)

    prepared = prepare_params(params)            # weight masking/flattening hoisted here
    fwd = jax.jit(autoregressive_multi_conv2d)
    mean, std = fwd(prepared, x, ctx)
    jax.block_until_ready((mean, std))

    ref_mean, ref_std = reference_forward(params, x, ctx)
    assert mean.shape == (N, out_channels, H, W)
    assert std.shape == (N, out_channels, H, W)
    assert jnp.allclose(mean, ref_mean, atol=1e-4, rtol=1e-4)
    assert jnp.allclose(std, ref_std, atol=1e-4, rtol=1e-4)
    print("KERNEL_OK")
</pallas_src>

<mosaic_0001>
module attributes {stable_mosaic.version = 11 : i64} {
  func.func @kernel(%arg0: i32, %arg1: memref<1x8x256xf32, #tpu.memory_space<vmem>>, %arg2: memref<1x32x256xf32, #tpu.memory_space<vmem>>, %arg3: memref<9x256xf32, #tpu.memory_space<vmem>>, %arg4: memref<32x73xf32, #tpu.memory_space<vmem>>, %arg5: memref<32x289xf32, #tpu.memory_space<vmem>>, %arg6: memref<8x289xf32, #tpu.memory_space<vmem>>, %arg7: memref<1x8x256xf32, #tpu.memory_space<vmem>>, %arg8: memref<289x256xf32, #tpu.memory_space<vmem>>) attributes {dimension_semantics = [#tpu.dimension_semantics<parallel>], iteration_bounds = array<i64: 2>, scalar_prefetch = 0 : i64, scratch_operands = 1 : i64, tpu.core_type = #tpu.core_type<tc>, window_params = [{transform_indices = @transform_0, window_bounds = array<i64: 1, 8, 256>}, {transform_indices = @transform_1, window_bounds = array<i64: 1, 32, 256>}, {pipeline_mode = #tpu.pipeline_mode<synchronous>, transform_indices = @transform_2, window_bounds = array<i64: 9, 256>}, {pipeline_mode = #tpu.pipeline_mode<synchronous>, transform_indices = @transform_3, window_bounds = array<i64: 32, 73>}, {pipeline_mode = #tpu.pipeline_mode<synchronous>, transform_indices = @transform_4, window_bounds = array<i64: 32, 289>}, {pipeline_mode = #tpu.pipeline_mode<synchronous>, transform_indices = @transform_5, window_bounds = array<i64: 8, 289>}, {transform_indices = @transform_6, window_bounds = array<i64: 1, 8, 256>}]} {
    %c0 = arith.constant 0 : index
    %c0_0 = arith.constant 0 : index
    %0 = vector.load %arg3[%c0, %c0_0] : memref<9x256xf32, #tpu.memory_space<vmem>>, vector<9x256xf32>
    %c0_1 = arith.constant 0 : index
    %c0_2 = arith.constant 0 : index
    %c0_3 = arith.constant 0 : index
    %1 = vector.load %arg2[%c0_1, %c0_2, %c0_3] : memref<1x32x256xf32, #tpu.memory_space<vmem>>, vector<1x32x256xf32>
    %2 = vector.shape_cast %1 : vector<1x32x256xf32> to vector<32x256xf32>
    %c0_4 = arith.constant 0 : index
    %c0_5 = arith.constant 0 : index
    %c0_6 = arith.constant 0 : index
    %3 = vector.load %arg1[%c0_4, %c0_5, %c0_6] : memref<1x8x256xf32, #tpu.memory_space<vmem>>, vector<1x8x256xf32>
    %4 = vector.shape_cast %3 : vector<1x8x256xf32> to vector<8x256xf32>
    %c17_i32 = arith.constant 17 : i32
    %5 = tpu.dynamic_rotate %4 by %c17_i32 dim 1 : vector<8x256xf32>, i32 -> vector<8x256xf32>
    %6 = vector.extract_strided_slice %0 {offsets = [0, 0], sizes = [1, 256], strides = [1, 1]} : vector<9x256xf32> to vector<1x256xf32>
    %7 = vector.broadcast %6 : vector<1x256xf32> to vector<8x256xf32>
    %8 = arith.mulf %5, %7 : vector<8x256xf32>
    %c0_7 = arith.constant 0 : index
    %c0_8 = arith.constant 0 : index
    %9 = vector.load %arg8[%c0_7, %c0_8] : memref<289x256xf32, #tpu.memory_space<vmem>>, vector<8x256xf32>
    tpu.vector_store %arg8[%c0_7, %c0_8], %8 {strides = array<i32>} : memref<289x256xf32, #tpu.memory_space<vmem>>, vector<8x256xf32>,
    %c16_i32 = arith.constant 16 : i32
    %10 = tpu.dynamic_rotate %4 by %c16_i32 dim 1 : vector<8x256xf32>, i32 -> vector<8x256xf32>
    %11 = vector.extract_strided_slice %0 {offsets = [1, 0], sizes = [1, 256], strides = [1, 1]} : vector<9x256xf32> to vector<1x256xf32>
    %12 = vector.broadcast %11 : vector<1x256xf32> to vector<8x256xf32>
    %13 = arith.mulf %10, %12 : vector<8x256xf32>
    %c8 = arith.constant 8 : index
    %c0_9 = arith.constant 0 : index
    %14 = vector.load %arg8[%c8, %c0_9] : memref<289x256xf32, #tpu.memory_space<vmem>>, vector<8x256xf32>
    tpu.vector_store %arg8[%c8, %c0_9], %13 {strides = array<i32>} : memref<289x256xf32, #tpu.memory_space<vmem>>, vector<8x256xf32>,
    %c15_i32 = arith.constant 15 : i32
    %15 = tpu.dynamic_rotate %4 by %c15_i32 dim 1 : vector<8x256xf32>, i32 -> vector<8x256xf32>
    %16 = vector.extract_strided_slice %0 {offsets = [2, 0], sizes = [1, 256], strides = [1, 1]} : vector<9x256xf32> to vector<1x256xf32>
    %17 = vector.broadcast %16 : vector<1x256xf32> to vector<8x256xf32>
    %18 = arith.mulf %15, %17 : vector<8x256xf32>
    %c16 = arith.constant 16 : index
    %c0_10 = arith.constant 0 : index
    %19 = vector.load %arg8[%c16, %c0_10] : memref<289x256xf32, #tpu.memory_space<vmem>>, vector<8x256xf32>
    tpu.vector_store %arg8[%c16, %c0_10], %18 {strides = array<i32>} : memref<289x256xf32, #tpu.memory_space<vmem>>, vector<8x256xf32>,
    %c1_i32 = arith.constant 1 : i32
    %20 = tpu.dynamic_rotate %4 by %c1_i32 dim 1 : vector<8x256xf32>, i32 -> vector<8x256xf32>
    %21 = vector.extract_strided_slice %0 {offsets = [3, 0], sizes = [1, 256], strides = [1, 1]} : vector<9x256xf32> to vector<1x256xf32>
    %22 = vector.broadcast %21 : vector<1x256xf32> to vector<8x256xf32>
    %23 = arith.mulf %20, %22 : vector<8x256xf32>
    %c24 = arith.constant 24 : index
    %c0_11 = arith.constant 0 : index
    %24 = vector.load %arg8[%c24, %c0_11] : memref<289x256xf32, #tpu.memory_space<vmem>>, vector<8x256xf32>
    tpu.vector_store %arg8[%c24, %c0_11], %23 {strides = array<i32>} : memref<289x256xf32, #tpu.memory_space<vmem>>, vector<8x256xf32>,
    %c32 = arith.constant 32 : index
    %c0_12 = arith.constant 0 : index
    %25 = vector.load %arg8[%c32, %c0_12] : memref<289x256xf32, #tpu.memory_space<vmem>>, vector<8x256xf32>
    tpu.vector_store %arg8[%c32, %c0_12], %4 {strides = array<i32>} : memref<289x256xf32, #tpu.memory_space<vmem>>, vector<8x256xf32>,
    %c255_i32 = arith.constant 255 : i32
    %26 = tpu.dynamic_rotate %4 by %c255_i32 dim 1 : vector<8x256xf32>, i32 -> vector<8x256xf32>
    %27 = vector.extract_strided_slice %0 {offsets = [5, 0], sizes = [1, 256], strides = [1, 1]} : vector<9x256xf32> to vector<1x256xf32>
    %28 = vector.broadcast %27 : vector<1x256xf32> to vector<8x256xf32>
    %29 = arith.mulf %26, %28 : vector<8x256xf32>
    %c40 = arith.constant 40 : index
    %c0_13 = arith.constant 0 : index
    %30 = vector.load %arg8[%c40, %c0_13] : memref<289x256xf32, #tpu.memory_space<vmem>>, vector<8x256xf32>
    tpu.vector_store %arg8[%c40, %c0_13], %29 {strides = array<i32>} : memref<289x256xf32, #tpu.memory_space<vmem>>, vector<8x256xf32>,
    %c241_i32 = arith.constant 241 : i32
    %31 = tpu.dynamic_rotate %4 by %c241_i32 dim 1 : vector<8x256xf32>, i32 -> vector<8x256xf32>
    %32 = vector.extract_strided_slice %0 {offsets = [6, 0], sizes = [1, 256], strides = [1, 1]} : vector<9x256xf32> to vector<1x256xf32>
    %33 = vector.broadcast %32 : vector<1x256xf32> to vector<8x256xf32>
    %34 = arith.mulf %31, %33 : vector<8x256xf32>
    %c48 = arith.constant 48 : index
    %c0_14 = arith.constant 0 : index
    %35 = vector.load %arg8[%c48, %c0_14] : memref<289x256xf32, #tpu.memory_space<vmem>>, vector<8x256xf32>
    tpu.vector_store %arg8[%c48, %c0_14], %34 {strides = array<i32>} : memref<289x256xf32, #tpu.memory_space<vmem>>, vector<8x256xf32>,
    %c240_i32 = arith.constant 240 : i32
    %36 = tpu.dynamic_rotate %4 by %c240_i32 dim 1 : vector<8x256xf32>, i32 -> vector<8x256xf32>
    %37 = vector.extract_strided_slice %0 {offsets = [7, 0], sizes = [1, 256], strides = [1, 1]} : vector<9x256xf32> to vector<1x256xf32>
    %38 = vector.broadcast %37 : vector<1x256xf32> to vector<8x256xf32>
    %39 = arith.mulf %36, %38 : vector<8x256xf32>
    %c56 = arith.constant 56 : index
    %c0_15 = arith.constant 0 : index
    %40 = vector.load %arg8[%c56, %c0_15] : memref<289x256xf32, #tpu.memory_space<vmem>>, vector<8x256xf32>
    tpu.vector_store %arg8[%c56, %c0_15], %39 {strides = array<i32>} : memref<289x256xf32, #tpu.memory_space<vmem>>, vector<8x256xf32>,
    %c239_i32 = arith.constant 239 : i32
    %41 = tpu.dynamic_rotate %4 by %c239_i32 dim 1 : vector<8x256xf32>, i32 -> vector<8x256xf32>
    %42 = vector.extract_strided_slice %0 {offsets = [8, 0], sizes = [1, 256], strides = [1, 1]} : vector<9x256xf32> to vector<1x256xf32>
    %43 = vector.broadcast %42 : vector<1x256xf32> to vector<8x256xf32>
    %44 = arith.mulf %41, %43 : vector<8x256xf32>
    %c64 = arith.constant 64 : index
    %c0_16 = arith.constant 0 : index
    %45 = vector.load %arg8[%c64, %c0_16] : memref<289x256xf32, #tpu.memory_space<vmem>>, vector<8x256xf32>
    tpu.vector_store %arg8[%c64, %c0_16], %44 {strides = array<i32>} : memref<289x256xf32, #tpu.memory_space<vmem>>, vector<8x256xf32>,
    %cst = arith.constant 1.000000e+00 : f32
    %46 = vector.broadcast %cst : f32 to vector<1x256xf32>
    %c72 = arith.constant 72 : index
    %c0_17 = arith.constant 0 : index
    %47 = vector.load %arg8[%c72, %c0_17] : memref<289x256xf32, #tpu.memory_space<vmem>>, vector<1x256xf32>
    tpu.vector_store %arg8[%c72, %c0_17], %46 {strides = array<i32>} : memref<289x256xf32, #tpu.memory_space<vmem>>, vector<1x256xf32>,
    %c0_18 = arith.constant 0 : index
    %c0_19 = arith.constant 0 : index
    %48 = vector.load %arg4[%c0_18, %c0_19] : memref<32x73xf32, #tpu.memory_space<vmem>>, vector<32x73xf32>
    %c0_20 = arith.constant 0 : index
    %c0_21 = arith.constant 0 : index
    %49 = vector.load %arg8[%c0_20, %c0_21] : memref<289x256xf32, #tpu.memory_space<vmem>>, vector<73x256xf32>
    %cst_22 = arith.constant dense<0.000000e+00> : vector<32x256xf32>
    %50 = tpu.matmul %48, %49, %cst_22 {dimension_numbers = #tpu.dot_dimension_numbers<[1], [0], [0], [1], [0, 0, 1, 1], [], []>} : vector<32x73xf32>, vector<73x256xf32>, vector<32x256xf32> -> vector<32x256xf32>
    %51 = arith.addf %50, %2 : vector<32x256xf32>
    %cst_23 = arith.constant 0.000000e+00 : f32
    %52 = vector.broadcast %cst_23 : f32 to vector<32x256xf32>
    %53 = arith.cmpf ogt, %51, %52 : vector<32x256xf32>
    %cst_24 = arith.constant 0.000000e+00 : f32
    %54 = vector.broadcast %cst_24 : f32 to vector<32x256xf32>
    %55 = arith.minimumf %51, %54 : vector<32x256xf32>
    %56 = math.exp %55 : vector<32x256xf32>
    %cst_25 = arith.constant 1.000000e+00 : f32
    %57 = vector.broadcast %cst_25 : f32 to vector<32x256xf32>
    %58 = arith.subf %56, %57 : vector<32x256xf32>
    %59 = arith.select %53, %51, %58 : vector<32x256xi1>, vector<32x256xf32>
    %c17_i32_26 = arith.constant 17 : i32
    %60 = tpu.dynamic_rotate %59 by %c17_i32_26 dim 1 : vector<32x256xf32>, i32 -> vector<32x256xf32>
    %61 = vector.extract_strided_slice %0 {offsets = [0, 0], sizes = [1, 256], strides = [1, 1]} : vector<9x256xf32> to vector<1x256xf32>
    %62 = vector.broadcast %61 : vector<1x256xf32> to vector<32x256xf32>
    %63 = arith.mulf %60, %62 : vector<32x256xf32>
    %c0_27 = arith.constant 0 : index
    %c0_28 = arith.constant 0 : index
    %64 = vector.load %arg8[%c0_27, %c0_28] : memref<289x256xf32, #tpu.memory_space<vmem>>, vector<32x256xf32>
    tpu.vector_store %arg8[%c0_27, %c0_28], %63 {strides = array<i32>} : memref<289x256xf32, #tpu.memory_space<vmem>>, vector<32x256xf32>,
    %c16_i32_29 = arith.constant 16 : i32
    %65 = tpu.dynamic_rotate %59 by %c16_i32_29 dim 1 : vector<32x256xf32>, i32 -> vector<32x256xf32>
    %66 = vector.extract_strided_slice %0 {offsets = [1, 0], sizes = [1, 256], strides = [1, 1]} : vector<9x256xf32> to vector<1x256xf32>
    %67 = vector.broadcast %66 : vector<1x256xf32> to vector<32x256xf32>
    %68 = arith.mulf %65, %67 : vector<32x256xf32>
    %c32_30 = arith.constant 32 : index
    %c0_31 = arith.constant 0 : index
    %69 = vector.load %arg8[%c32_30, %c0_31] : memref<289x256xf32, #tpu.memory_space<vmem>>, vector<32x256xf32>
    tpu.vector_store %arg8[%c32_30, %c0_31], %68 {strides = array<i32>} : memref<289x256xf32, #tpu.memory_space<vmem>>, vector<32x256xf32>,
    %c15_i32_32 = arith.constant 15 : i32
    %70 = tpu.dynamic_rotate %59 by %c15_i32_32 dim 1 : vector<32x256xf32>, i32 -> vector<32x256xf32>
    %71 = vector.extract_strided_slice %0 {offsets = [2, 0], sizes = [1, 256], strides = [1, 1]} : vector<9x256xf32> to vector<1x256xf32>
    %72 = vector.broadcast %71 : vector<1x256xf32> to vector<32x256xf32>
    %73 = arith.mulf %70, %72 : vector<32x256xf32>
    %c64_33 = arith.constant 64 : index
    %c0_34 = arith.constant 0 : index
    %74 = vector.load %arg8[%c64_33, %c0_34] : memref<289x256xf32, #tpu.memory_space<vmem>>, vector<32x256xf32>
    tpu.vector_store %arg8[%c64_33, %c0_34], %73 {strides = array<i32>} : memref<289x256xf32, #tpu.memory_space<vmem>>, vector<32x256xf32>,
    %c1_i32_35 = arith.constant 1 : i32
    %75 = tpu.dynamic_rotate %59 by %c1_i32_35 dim 1 : vector<32x256xf32>, i32 -> vector<32x256xf32>
    %76 = vector.extract_strided_slice %0 {offsets = [3, 0], sizes = [1, 256], strides = [1, 1]} : vector<9x256xf32> to vector<1x256xf32>
    %77 = vector.broadcast %76 : vector<1x256xf32> to vector<32x256xf32>
    %78 = arith.mulf %75, %77 : vector<32x256xf32>
    %c96 = arith.constant 96 : index
    %c0_36 = arith.constant 0 : index
    %79 = vector.load %arg8[%c96, %c0_36] : memref<289x256xf32, #tpu.memory_space<vmem>>, vector<32x256xf32>
    tpu.vector_store %arg8[%c96, %c0_36], %78 {strides = array<i32>} : memref<289x256xf32, #tpu.memory_space<vmem>>, vector<32x256xf32>,
    %c128 = arith.constant 128 : index
    %c0_37 = arith.constant 0 : index
    %80 = vector.load %arg8[%c128, %c0_37] : memref<289x256xf32, #tpu.memory_space<vmem>>, vector<32x256xf32>
    tpu.vector_store %arg8[%c128, %c0_37], %59 {strides = array<i32>} : memref<289x256xf32, #tpu.memory_space<vmem>>, vector<32x256xf32>,
    %c255_i32_38 = arith.constant 255 : i32
    %81 = tpu.dynamic_rotate %59 by %c255_i32_38 dim 1 : vector<32x256xf32>, i32 -> vector<32x256xf32>
    %82 = vector.extract_strided_slice %0 {offsets = [5, 0], sizes = [1, 256], strides = [1, 1]} : vector<9x256xf32> to vector<1x256xf32>
    %83 = vector.broadcast %82 : vector<1x256xf32> to vector<32x256xf32>
    %84 = arith.mulf %81, %83 : vector<32x256xf32>
    %c160 = arith.constant 160 : index
    %c0_39 = arith.constant 0 : index
    %85 = vector.load %arg8[%c160, %c0_39] : memref<289x256xf32, #tpu.memory_space<vmem>>, vector<32x256xf32>
    tpu.vector_store %arg8[%c160, %c0_39], %84 {strides = array<i32>} : memref<289x256xf32, #tpu.memory_space<vmem>>, vector<32x256xf32>,
    %c241_i32_40 = arith.constant 241 : i32
    %86 = tpu.dynamic_rotate %59 by %c241_i32_40 dim 1 : vector<32x256xf32>, i32 -> vector<32x256xf32>
    %87 = vector.extract_strided_slice %0 {offsets = [6, 0], sizes = [1, 256], strides = [1, 1]} : vector<9x256xf32> to vector<1x256xf32>
    %88 = vector.broadcast %87 : vector<1x256xf32> to vector<32x256xf32>
    %89 = arith.mulf %86, %88 : vector<32x256xf32>
    %c192 = arith.constant 192 : index
    %c0_41 = arith.constant 0 : index
    %90 = vector.load %arg8[%c192, %c0_41] : memref<289x256xf32, #tpu.memory_space<vmem>>, vector<32x256xf32>
    tpu.vector_store %arg8[%c192, %c0_41], %89 {strides = array<i32>} : memref<289x256xf32, #tpu.memory_space<vmem>>, vector<32x256xf32>,
    %c240_i32_42 = arith.constant 240 : i32
    %91 = tpu.dynamic_rotate %59 by %c240_i32_42 dim 1 : vector<32x256xf32>, i32 -> vector<32x256xf32>
    %92 = vector.extract_strided_slice %0 {offsets = [7, 0], sizes = [1, 256], strides = [1, 1]} : vector<9x256xf32> to vector<1x256xf32>
    %93 = vector.broadcast %92 : vector<1x256xf32> to vector<32x256xf32>
    %94 = arith.mulf %91, %93 : vector<32x256xf32>
    %c224 = arith.constant 224 : index
    %c0_43 = arith.constant 0 : index
    %95 = vector.load %arg8[%c224, %c0_43] : memref<289x256xf32, #tpu.memory_space<vmem>>, vector<32x256xf32>
    tpu.vector_store %arg8[%c224, %c0_43], %94 {strides = array<i32>} : memref<289x256xf32, #tpu.memory_space<vmem>>, vector<32x256xf32>,
    %c239_i32_44 = arith.constant 239 : i32
    %96 = tpu.dynamic_rotate %59 by %c239_i32_44 dim 1 : vector<32x256xf32>, i32 -> vector<32x256xf32>
    %97 = vector.extract_strided_slice %0 {offsets = [8, 0], sizes = [1, 256], strides = [1, 1]} : vector<9x256xf32> to vector<1x256xf32>
    %98 = vector.broadcast %97 : vector<1x256xf32> to vector<32x256xf32>
    %99 = arith.mulf %96, %98 : vector<32x256xf32>
    %c256 = arith.constant 256 : index
    %c0_45 = arith.constant 0 : index
    %100 = vector.load %arg8[%c256, %c0_45] : memref<289x256xf32, #tpu.memory_space<vmem>>, vector<32x256xf32>
    tpu.vector_store %arg8[%c256, %c0_45], %99 {strides = array<i32>} : memref<289x256xf32, #tpu.memory_space<vmem>>, vector<32x256xf32>,
    %cst_46 = arith.constant 1.000000e+00 : f32
    %101 = vector.broadcast %cst_46 : f32 to vector<1x256xf32>
    %c288 = arith.constant 288 : index
    %c0_47 = arith.constant 0 : index
    %102 = vector.load %arg8[%c288, %c0_47] : memref<289x256xf32, #tpu.memory_space<vmem>>, vector<1x256xf32>
    tpu.vector_store %arg8[%c288, %c0_47], %101 {strides = array<i32>} : memref<289x256xf32, #tpu.memory_space<vmem>>, vector<1x256xf32>,
    %c0_48 = arith.constant 0 : index
    %c0_49 = arith.constant 0 : index
    %103 = vector.load %arg5[%c0_48, %c0_49] : memref<32x289xf32, #tpu.memory_space<vmem>>, vector<32x289xf32>
    %c0_50 = arith.constant 0 : index
    %c0_51 = arith.constant 0 : index
    %104 = vector.load %arg8[%c0_50, %c0_51] : memref<289x256xf32, #tpu.memory_space<vmem>>, vector<289x256xf32>
    %cst_52 = arith.constant dense<0.000000e+00> : vector<32x256xf32>
    %105 = tpu.matmul %103, %104, %cst_52 {dimension_numbers = #tpu.dot_dimension_numbers<[1], [0], [0], [1], [0, 0, 1, 1], [], []>} : vector<32x289xf32>, vector<289x256xf32>, vector<32x256xf32> -> vector<32x256xf32>
    %106 = arith.addf %105, %2 : vector<32x256xf32>
    %cst_53 = arith.constant 0.000000e+00 : f32
    %107 = vector.broadcast %cst_53 : f32 to vector<32x256xf32>
    %108 = arith.cmpf ogt, %106, %107 : vector<32x256xf32>
    %cst_54 = arith.constant 0.000000e+00 : f32
    %109 = vector.broadcast %cst_54 : f32 to vector<32x256xf32>
    %110 = arith.minimumf %106, %109 : vector<32x256xf32>
    %111 = math.exp %110 : vector<32x256xf32>
    %cst_55 = arith.constant 1.000000e+00 : f32
    %112 = vector.broadcast %cst_55 : f32 to vector<32x256xf32>
    %113 = arith.subf %111, %112 : vector<32x256xf32>
    %114 = arith.select %108, %106, %113 : vector<32x256xi1>, vector<32x256xf32>
    %c17_i32_56 = arith.constant 17 : i32
    %115 = tpu.dynamic_rotate %114 by %c17_i32_56 dim 1 : vector<32x256xf32>, i32 -> vector<32x256xf32>
    %116 = vector.extract_strided_slice %0 {offsets = [0, 0], sizes = [1, 256], strides = [1, 1]} : vector<9x256xf32> to vector<1x256xf32>
    %117 = vector.broadcast %116 : vector<1x256xf32> to vector<32x256xf32>
    %118 = arith.mulf %115, %117 : vector<32x256xf32>
    %c0_57 = arith.constant 0 : index
    %c0_58 = arith.constant 0 : index
    %119 = vector.load %arg8[%c0_57, %c0_58] : memref<289x256xf32, #tpu.memory_space<vmem>>, vector<32x256xf32>
    tpu.vector_store %arg8[%c0_57, %c0_58], %118 {strides = array<i32>} : memref<289x256xf32, #tpu.memory_space<vmem>>, vector<32x256xf32>,
    %c16_i32_59 = arith.constant 16 : i32
    %120 = tpu.dynamic_rotate %114 by %c16_i32_59 dim 1 : vector<32x256xf32>, i32 -> vector<32x256xf32>
    %121 = vector.extract_strided_slice %0 {offsets = [1, 0], sizes = [1, 256], strides = [1, 1]} : vector<9x256xf32> to vector<1x256xf32>
    %122 = vector.broadcast %121 : vector<1x256xf32> to vector<32x256xf32>
    %123 = arith.mulf %120, %122 : vector<32x256xf32>
    %c32_60 = arith.constant 32 : index
    %c0_61 = arith.constant 0 : index
    %124 = vector.load %arg8[%c32_60, %c0_61] : memref<289x256xf32, #tpu.memory_space<vmem>>, vector<32x256xf32>
    tpu.vector_store %arg8[%c32_60, %c0_61], %123 {strides = array<i32>} : memref<289x256xf32, #tpu.memory_space<vmem>>, vector<32x256xf32>,
    %c15_i32_62 = arith.constant 15 : i32
    %125 = tpu.dynamic_rotate %114 by %c15_i32_62 dim 1 : vector<32x256xf32>, i32 -> vector<32x256xf32>
    %126 = vector.extract_strided_slice %0 {offsets = [2, 0], sizes = [1, 256], strides = [1, 1]} : vector<9x256xf32> to vector<1x256xf32>
    %127 = vector.broadcast %126 : vector<1x256xf32> to vector<32x256xf32>
    %128 = arith.mulf %125, %127 : vector<32x256xf32>
    %c64_63 = arith.constant 64 : index
    %c0_64 = arith.constant 0 : index
    %129 = vector.load %arg8[%c64_63, %c0_64] : memref<289x256xf32, #tpu.memory_space<vmem>>, vector<32x256xf32>
    tpu.vector_store %arg8[%c64_63, %c0_64], %128 {strides = array<i32>} : memref<289x256xf32, #tpu.memory_space<vmem>>, vector<32x256xf32>,
    %c1_i32_65 = arith.constant 1 : i32
    %130 = tpu.dynamic_rotate %114 by %c1_i32_65 dim 1 : vector<32x256xf32>, i32 -> vector<32x256xf32>
    %131 = vector.extract_strided_slice %0 {offsets = [3, 0], sizes = [1, 256], strides = [1, 1]} : vector<9x256xf32> to vector<1x256xf32>
    %132 = vector.broadcast %131 : vector<1x256xf32> to vector<32x256xf32>
    %133 = arith.mulf %130, %132 : vector<32x256xf32>
    %c96_66 = arith.constant 96 : index
    %c0_67 = arith.constant 0 : index
    %134 = vector.load %arg8[%c96_66, %c0_67] : memref<289x256xf32, #tpu.memory_space<vmem>>, vector<32x256xf32>
    tpu.vector_store %arg8[%c96_66, %c0_67], %133 {strides = array<i32>} : memref<289x256xf32, #tpu.memory_space<vmem>>, vector<32x256xf32>,
    %c128_68 = arith.constant 128 : index
    %c0_69 = arith.constant 0 : index
    %135 = vector.load %arg8[%c128_68, %c0_69] : memref<289x256xf32, #tpu.memory_space<vmem>>, vector<32x256xf32>
    tpu.vector_store %arg8[%c128_68, %c0_69], %114 {strides = array<i32>} : memref<289x256xf32, #tpu.memory_space<vmem>>, vector<32x256xf32>,
    %c255_i32_70 = arith.constant 255 : i32
    %136 = tpu.dynamic_rotate %114 by %c255_i32_70 dim 1 : vector<32x256xf32>, i32 -> vector<32x256xf32>
    %137 = vector.extract_strided_slice %0 {offsets = [5, 0], sizes = [1, 256], strides = [1, 1]} : vector<9x256xf32> to vector<1x256xf32>
    %138 = vector.broadcast %137 : vector<1x256xf32> to vector<32x256xf32>
    %139 = arith.mulf %136, %138 : vector<32x256xf32>
    %c160_71 = arith.constant 160 : index
    %c0_72 = arith.constant 0 : index
    %140 = vector.load %arg8[%c160_71, %c0_72] : memref<289x256xf32, #tpu.memory_space<vmem>>, vector<32x256xf32>
    tpu.vector_store %arg8[%c160_71, %c0_72], %139 {strides = array<i32>} : memref<289x256xf32, #tpu.memory_space<vmem>>, vector<32x256xf32>,
    %c241_i32_73 = arith.constant 241 : i32
    %141 = tpu.dynamic_rotate %114 by %c241_i32_73 dim 1 : vector<32x256xf32>, i32 -> vector<32x256xf32>
    %142 = vector.extract_strided_slice %0 {offsets = [6, 0], sizes = [1, 256], strides = [1, 1]} : vector<9x256xf32> to vector<1x256xf32>
    %143 = vector.broadcast %142 : vector<1x256xf32> to vector<32x256xf32>
    %144 = arith.mulf %141, %143 : vector<32x256xf32>
    %c192_74 = arith.constant 192 : index
    %c0_75 = arith.constant 0 : index
    %145 = vector.load %arg8[%c192_74, %c0_75] : memref<289x256xf32, #tpu.memory_space<vmem>>, vector<32x256xf32>
    tpu.vector_store %arg8[%c192_74, %c0_75], %144 {strides = array<i32>} : memref<289x256xf32, #tpu.memory_space<vmem>>, vector<32x256xf32>,
    %c240_i32_76 = arith.constant 240 : i32
    %146 = tpu.dynamic_rotate %114 by %c240_i32_76 dim 1 : vector<32x256xf32>, i32 -> vector<32x256xf32>
    %147 = vector.extract_strided_slice %0 {offsets = [7, 0], sizes = [1, 256], strides = [1, 1]} : vector<9x256xf32> to vector<1x256xf32>
    %148 = vector.broadcast %147 : vector<1x256xf32> to vector<32x256xf32>
    %149 = arith.mulf %146, %148 : vector<32x256xf32>
    %c224_77 = arith.constant 224 : index
    %c0_78 = arith.constant 0 : index
    %150 = vector.load %arg8[%c224_77, %c0_78] : memref<289x256xf32, #tpu.memory_space<vmem>>, vector<32x256xf32>
    tpu.vector_store %arg8[%c224_77, %c0_78], %149 {strides = array<i32>} : memref<289x256xf32, #tpu.memory_space<vmem>>, vector<32x256xf32>,
    %c239_i32_79 = arith.constant 239 : i32
    %151 = tpu.dynamic_rotate %114 by %c239_i32_79 dim 1 : vector<32x256xf32>, i32 -> vector<32x256xf32>
    %152 = vector.extract_strided_slice %0 {offsets = [8, 0], sizes = [1, 256], strides = [1, 1]} : vector<9x256xf32> to vector<1x256xf32>
    %153 = vector.broadcast %152 : vector<1x256xf32> to vector<32x256xf32>
    %154 = arith.mulf %151, %153 : vector<32x256xf32>
    %c256_80 = arith.constant 256 : index
    %c0_81 = arith.constant 0 : index
    %155 = vector.load %arg8[%c256_80, %c0_81] : memref<289x256xf32, #tpu.memory_space<vmem>>, vector<32x256xf32>
    tpu.vector_store %arg8[%c256_80, %c0_81], %154 {strides = array<i32>} : memref<289x256xf32, #tpu.memory_space<vmem>>, vector<32x256xf32>,
    %cst_82 = arith.constant 1.000000e+00 : f32
    %156 = vector.broadcast %cst_82 : f32 to vector<1x256xf32>
    %c288_83 = arith.constant 288 : index
    %c0_84 = arith.constant 0 : index
    %157 = vector.load %arg8[%c288_83, %c0_84] : memref<289x256xf32, #tpu.memory_space<vmem>>, vector<1x256xf32>
    tpu.vector_store %arg8[%c288_83, %c0_84], %156 {strides = array<i32>} : memref<289x256xf32, #tpu.memory_space<vmem>>, vector<1x256xf32>,
    %c0_85 = arith.constant 0 : index
    %c0_86 = arith.constant 0 : index
    %158 = vector.load %arg6[%c0_85, %c0_86] : memref<8x289xf32, #tpu.memory_space<vmem>>, vector<8x289xf32>
    %c0_87 = arith.constant 0 : index
    %c0_88 = arith.constant 0 : index
    %159 = vector.load %arg8[%c0_87, %c0_88] : memref<289x256xf32, #tpu.memory_space<vmem>>, vector<289x256xf32>
    %cst_89 = arith.constant dense<0.000000e+00> : vector<8x256xf32>
    %160 = tpu.matmul %158, %159, %cst_89 {dimension_numbers = #tpu.dot_dimension_numbers<[1], [0], [0], [1], [0, 0, 1, 1], [], []>} : vector<8x289xf32>, vector<289x256xf32>, vector<8x256xf32> -> vector<8x256xf32>
    %cst_90 = arith.constant 0.000000e+00 : f32
    %161 = vector.broadcast %cst_90 : f32 to vector<8x256xf32>
    %162 = arith.cmpf ogt, %160, %161 : vector<8x256xf32>
    %cst_91 = arith.constant 0.000000e+00 : f32
    %163 = vector.broadcast %cst_91 : f32 to vector<8x256xf32>
    %164 = arith.minimumf %160, %163 : vector<8x256xf32>
    %165 = math.exp %164 : vector<8x256xf32>
    %cst_92 = arith.constant 1.000000e+00 : f32
    %166 = vector.broadcast %cst_92 : f32 to vector<8x256xf32>
    %167 = arith.subf %165, %166 : vector<8x256xf32>
    %168 = arith.select %162, %160, %167 : vector<8x256xi1>, vector<8x256xf32>
    %c0_93 = arith.constant 0 : index
    %c0_94 = arith.constant 0 : index
    %c0_95 = arith.constant 0 : index
    %169 = vector.load %arg7[%c0_93, %c0_94, %c0_95] : memref<1x8x256xf32, #tpu.memory_space<vmem>>, vector<1x8x256xf32>
    %170 = vector.shape_cast %169 : vector<1x8x256xf32> to vector<8x256xf32>
    %171 = vector.shape_cast %168 : vector<8x256xf32> to vector<1x8x256xf32>
    tpu.vector_store %arg7[%c0_93, %c0_94, %c0_95], %171 {strides = array<i32>} : memref<1x8x256xf32, #tpu.memory_space<vmem>>, vector<1x8x256xf32>,
    return
  }
  func.func @transform_0(%arg0: i32) -> (i32, i32, i32) {
    %c0_i32 = arith.constant 0 : i32
    %c0_i32_0 = arith.constant 0 : i32
    %c0_i32_1 = arith.constant 0 : i32
    return %arg0, %c0_i32, %c0_i32_0 : i32, i32, i32
  }
  func.func @transform_1(%arg0: i32) -> (i32, i32, i32) {
    %c0_i32 = arith.constant 0 : i32
    %c0_i32_0 = arith.constant 0 : i32
    %c0_i32_1 = arith.constant 0 : i32
    return %arg0, %c0_i32, %c0_i32_0 : i32, i32, i32
  }
  func.func @transform_2(%arg0: i32) -> (i32, i32) {
    %c0_i32 = arith.constant 0 : i32
    %c0_i32_0 = arith.constant 0 : i32
    %c0_i32_1 = arith.constant 0 : i32
    return %c0_i32, %c0_i32_0 : i32, i32
  }
  func.func @transform_3(%arg0: i32) -> (i32, i32) {
    %c0_i32 = arith.constant 0 : i32
    %c0_i32_0 = arith.constant 0 : i32
    %c0_i32_1 = arith.constant 0 : i32
    return %c0_i32, %c0_i32_0 : i32, i32
  }
  func.func @transform_4(%arg0: i32) -> (i32, i32) {
    %c0_i32 = arith.constant 0 : i32
    %c0_i32_0 = arith.constant 0 : i32
    %c0_i32_1 = arith.constant 0 : i32
    return %c0_i32, %c0_i32_0 : i32, i32
  }
  func.func @transform_5(%arg0: i32) -> (i32, i32) {
    %c0_i32 = arith.constant 0 : i32
    %c0_i32_0 = arith.constant 0 : i32
    %c0_i32_1 = arith.constant 0 : i32
    return %c0_i32, %c0_i32_0 : i32, i32
  }
  func.func @transform_6(%arg0: i32) -> (i32, i32, i32) {
    %c0_i32 = arith.constant 0 : i32
    %c0_i32_0 = arith.constant 0 : i32
    %c0_i32_1 = arith.constant 0 : i32
    return %arg0, %c0_i32, %c0_i32_0 : i32, i32, i32
  }
}

</mosaic_0001>

<bundles_post_ra>
// kernel: autoregressive_multi_conv2d.1
= control target key start
LH: loop header
LB: loop body
LE: loop exit
PB: predicated region body
PF: predicated region fallthrough
CT: control target
= control target key end

     0   :  { %s2277_s21 = smov 0   ;;  %s3444_s0 = inlined_call_operand.vmem [shape: f32[2,8,256], index: 0, kind: input, shape index: {}]   ;;  %s3445_s1 = inlined_call_operand.vmem [shape: f32[2,32,256], index: 1, kind: input, shape index: {}]   ;;  %s3446_s2 = inlined_call_operand.vmem [shape: f32[9,256], index: 2, kind: input, shape index: {}]   ;;  %s3447_s3 = inlined_call_operand.vmem [shape: f32[32,73], index: 3, kind: input, shape index: {}]   ;;  %s3448_s4 = inlined_call_operand.vmem [shape: f32[32,289], index: 4, kind: input, shape index: {}]   ;;  %s3449_s5 = inlined_call_operand.vmem [shape: f32[8,289], index: 5, kind: input, shape index: {}]   ;;  %s3450_s6 = inlined_call_operand.vmem [shape: f32[2,8,256], index: 6, kind: output, shape index: {}]  }
   0x1 LB: > { %s1931_s22 = sadd.s32 4294967295, %s2229_s21   ;;  %p1935_p0 = scmp.ge.s32.totalorder %s2229_s21, 1  ;;  %s2229_s21 = sphi %s2277_s21, %s16_s21  }
   0x2   : > { %p222_p1 = scmp.lt.s32.totalorder %s2229_s21, 3 }
   0x4   : > { %p223_p2 = pnand %p1935_p0, %p222_p1 }
   0x6   : > { %226 = sbr.rel (%p223_p2) target bundleno = 1375 (0x55f), region = 44 }
   0xd   : > { %p257_p3 = scmp.lt.s32.totalorder %s1931_s22, 1  ;;  %s2231_s27 = smov 16   ;;  %v290_v2 = vlaneseq  ;;  %v2234_v4 = vmov 1.0   ;;  %v3451_v5 = vmov 0.0   ;;  %v2349_v10 = vld [vmem:[%s3446_s2] sm:$0xff]  ;;  %v2354_v11 = vld [vmem:[%s3446_s2 + $0x8] sm:$0xff] }
   0xe   : > { %s2232_s28 = smov 17   ;;  %s2233_s29 = smov 15   ;;  %557 = vmatprep.mubr.f32.mxu0 %v3451_v5  ;;  %vm486_vm9 = vcmask 1040384   ;;  %vm2241_vm10 = vmmov 1   ;;  %vm473_vm12 = vcmask 596992  }
   0xf   : > { %s3485_s22 = smov (!%p257_p3, %s1931_s22), 1  ;;  %vm2309_vm0 = vcmp.lt.s32.totalorder %v290_v2, 256  ;;  %s2235_s30 = smov 1   ;;  %v2340_v6 = vshrl.u32 %v290_v2, 7  ;;  %v2342_v7 = vand.u32 127, %v290_v2  ;;  %vm1999_vm11 = vmpackc.low %vm486_vm9, %vm2241_vm10 }
  0x10   : > { %s1979_s23 = sshll.u32 %s3485_s22, 4  ;;  %447 = vst.msk [vmem:[#allocation2 + $0x90] ss:$8 sm:$0x3] %vm2309_vm0, %v2234_v4  ;;  %s2236_s7 = smov 127  }
  0x11   : > { %s261_s26 = scalar_lea.vmem %s3444_s0, %s1979_s23  ;;  %959 = vst.msk [vmem:[#allocation2 + $0x240] ss:$8 sm:$0x3] %vm2309_vm0, %v2234_v4  ;;  %s2237_s8 = smov 113   ;;  %v316_v8 = vsub.s32 1, %v2340_v6  ;;  %v297_v9 = vsub.s32 0, %v2340_v6 }
  0x12   : > { %v2293_v0 = vld [vmem:[%s261_s26] sm:$0xff]  ;;  %v2299_v1 = vld [vmem:[%s261_s26 + $0x8] sm:$0xff]  ;;  %s2239_s9 = smov 112   ;;  %s2240_s10 = smov 111   ;;  %vm311_vm1 = vcmp.lt.s32.totalorder %v2342_v7, 16  ;;  %vm292_vm2 = vcmp.lt.s32.totalorder %v2342_v7, 17 }
  0x13   : > { %307 = vrot.lane.b32.xlu1 %v2293_v0, %s2231_s27  ;;  %286 = vrot.lane.b32.xlu0 %v2293_v0, %s2232_s28  ;;  %v2359_v14 = vrot.slane %v2349_v10, %v316_v8  ;;  %v2362_v15 = vrot.slane %v2354_v11, %v316_v8  ;;  %v2365_v16 = vrot.slane %v2349_v10, %v297_v9  ;;  %v335_v20 = vsub.s32 2, %v2340_v6  ;;  %s1980_s14 = sshll.u32 %s3485_s22, 6  ;;  %s271_s20 = scalar_lea.vmem %s3450_s6, %s1979_s23 }
  0x14   : > { %v2368_v17 = vrot.slane %v2354_v11, %v297_v9  ;;  %v354_v21 = vsub.s32 3, %v2340_v6  ;;  %vm330_vm3 = vcmp.lt.s32.totalorder %v2342_v7, 15  ;;  %vm349_vm4 = vcmp.lt.s32.totalorder %v2342_v7, 1  ;;  %s2491_s17 = scalar_lea.vmem %s3445_s1, %s1980_s14 }
  0x15   : > { %v375_v34 = vsub.s32 5, %v2340_v6  ;;  %v2388_v35 = vrot.slane %v2349_v10, %v335_v20  ;;  %v2391_v36 = vrot.slane %v2354_v11, %v335_v20  ;;  %vm370_vm5 = vcmp.lt.s32.totalorder %v2342_v7, 127 }
  0x16   : > { %v2394_v37 = vrot.slane %v2349_v10, %v354_v21  ;;  %v2397_v38 = vrot.slane %v2354_v11, %v354_v21  ;;  %v394_v57 = vsub.s32 6, %v2340_v6  ;;  %v413_v60 = vsub.s32 7, %v2340_v6 }
  0x17   : > { %309 = vrot.lane.b32.xlu1 %v2299_v1, %s2231_s27  ;;  %288 = vrot.lane.b32.xlu0 %v2299_v1, %s2232_s28  ;;  %v2409_v45 = vrot.slane %v2349_v10, %v375_v34  ;;  %v2412_v46 = vrot.slane %v2354_v11, %v375_v34  ;;  %vm389_vm6 = vcmp.lt.s32.totalorder %v2342_v7, 113  ;;  %vm408_vm7 = vcmp.lt.s32.totalorder %v2342_v7, 112 }
  0x18   : > { %v2430_v8 = vrot.slane %v2349_v10, %v394_v57  ;;  %v2433_v9 = vrot.slane %v2354_v11, %v394_v57  ;;  %v2437_v6 = vrot.slane %v2349_v10, %v413_v60  ;;  %vm427_vm8 = vcmp.lt.s32.totalorder %v2342_v7, 111  ;;  %v1624_v7 = vld [vmem:[%s3449_s5 + $0x10] sm:$0xff] }
  0x1b   : > { %328 = vrot.lane.b32.xlu1 %v2299_v1, %s2233_s29  ;;  %326 = vrot.lane.b32.xlu0 %v2293_v0, %s2233_s29 }
  0x1f   : > { %347 = vrot.lane.b32.xlu1 %v2299_v1, %s2235_s30  ;;  %345 = vrot.lane.b32.xlu0 %v2293_v0, %s2235_s30 }
  0x23   : > { %368 = vrot.lane.b32.xlu1 %v2299_v1, %s2236_s7  ;;  %366 = vrot.lane.b32.xlu0 %v2293_v0, %s2236_s7 }
  0x27   : > { %387 = vrot.lane.b32.xlu1 %v2299_v1, %s2237_s8  ;;  %385 = vrot.lane.b32.xlu0 %v2293_v0, %s2237_s8 }
  0x2b   : > { %406 = vrot.lane.b32.xlu1 %v2299_v1, %s2239_s9  ;;  %404 = vrot.lane.b32.xlu0 %v2293_v0, %s2239_s9 }
  0x2f   : > { %425 = vrot.lane.b32.xlu1 %v2299_v1, %s2240_s10  ;;  %423 = vrot.lane.b32.xlu0 %v2293_v0, %s2240_s10 }
  0x85   : > { %v308_v12 = vpop.permute.xlu1 %307  ;;  %v287_v13 = vpop.permute.xlu0 %286 }
  0x89   : > { %v310_v18 = vpop.permute.xlu1 %309  ;;  %v289_v19 = vpop.permute.xlu0 %288 }
  0x8a   : > { %v312_v22 = vsel %vm311_vm1, %v308_v12, %v310_v18  ;;  %v313_v23 = vsel %vm311_vm1, %v310_v18, %v308_v12  ;;  %v293_v24 = vsel %vm292_vm2, %v287_v13, %v289_v19  ;;  %v294_v25 = vsel %vm292_vm2, %v289_v19, %v287_v13 }
  0x8b   : > { %v322_v26 = vmul.f32 %v2359_v14, %v313_v23  ;;  %v323_v27 = vmul.f32 %v2362_v15, %v312_v22  ;;  %v303_v28 = vmul.f32 %v2365_v16, %v294_v25  ;;  %v304_v29 = vmul.f32 %v2368_v17, %v293_v24  ;;  %v2458_v23 = vld [vmem:[%s3446_s2 + $0x10] ss:$0 sm:$0xff]  ;;  %v2463_v24 = vld [vmem:[%s3446_s2 + $0x18] ss:$0 sm:$0xff] }
  0x8c   : > { %v2440_v12 = vrot.slane %v2354_v11, %v413_v60 }
  0x8d   : > { %v329_v30 = vpop.permute.xlu1 %328  ;;  %v327_v31 = vpop.permute.xlu0 %326  ;;  %v1982_v32 = vpack.c.bf16 %v323_v27, %v304_v29  ;;  %v1984_v33 = vpack.c.bf16 %v322_v26, %v303_v28 }
  0x8e   : > { %v331_v39 = vsel %vm330_vm3, %v327_v31, %v329_v30  ;;  %v332_v40 = vsel %vm330_vm3, %v329_v30, %v327_v31  ;;  %v472_v31 = vld [vmem:[#allocation2 + $0x98] sm:$0x1] }
  0x8f   : > { %1983 = vmatprep.subr.bf16.mxu0 %v1982_v32  ;;  %v341_v47 = vmul.f32 %v2388_v35, %v332_v40  ;;  %v342_v48 = vmul.f32 %v2391_v36, %v331_v39  ;;  %v471_v32 = vld [vmem:[#allocation2 + $0x90] sm:$0x1] }
  0x90   : > { %1985 = vmatpush1.bf16.msra.mxu0 %v1984_v33 }
  0x91   : > { %v348_v41 = vpop.permute.xlu1 %347  ;;  %v346_v42 = vpop.permute.xlu0 %345 }
  0x92   : > { %v350_v43 = vsel %vm349_vm4, %v346_v42, %v348_v41  ;;  %v351_v44 = vsel %vm349_vm4, %v348_v41, %v346_v42  ;;  %v449_v41 = vld [vmem:[%s3447_s3] sm:$0xff]  ;;  %v450_v42 = vld [vmem:[%s3447_s3 + $0x8] sm:$0xff] }
  0x93   : > { %v360_v49 = vmul.f32 %v2394_v37, %v351_v44  ;;  %v361_v50 = vmul.f32 %v2397_v38, %v350_v43  ;;  %v451_v43 = vld [vmem:[%s3447_s3 + $0x10] sm:$0xff]  ;;  %v452_v44 = vld [vmem:[%s3447_s3 + $0x18] sm:$0xff] }
  0x95   : > { %v369_v51 = vpop.permute.xlu1 %368  ;;  %v367_v52 = vpop.permute.xlu0 %366  ;;  %v1986_v53 = vpack.c.bf16 %v361_v50, %v342_v48  ;;  %v1988_v54 = vpack.c.bf16 %v360_v49, %v341_v47  ;;  %v2494_v47 = vld [vmem:[%s2491_s17] sm:$0xff] }
  0x96   : > { %v371_v55 = vsel %vm370_vm5, %v367_v52, %v369_v51  ;;  %v372_v56 = vsel %vm370_vm5, %v369_v51, %v367_v52  ;;  %3464 = vst [vmem:[#allocation3_spill] sm:$0xff] %v2494_v47  ;;  %v2498_v51 = vld [vmem:[%s2491_s17 + $0x10] sm:$0xff] }
  0x97   : > { %v381_v58 = vmul.f32 %v2409_v45, %v371_v55  ;;  %v382_v59 = vmul.f32 %v2412_v46, %v372_v56  ;;  %1987 = vmatprep.subr.bf16.mxu0 %v1986_v53  ;;  %3465 = vst [vmem:[#allocation4_spill] sm:$0xff] %v2498_v51 }
  0x98   : > { %1989 = vmatpush1.bf16.msra.mxu0 %v1988_v54 }
  0x99   : > { %v388_v61 = vpop.permute.xlu1 %387  ;;  %v386_v62 = vpop.permute.xlu0 %385  ;;  %v1990_v63 = vpack.c.bf16 %v382_v59, %v2299_v1  ;;  %v1992_v2 = vpack.c.bf16 %v381_v58, %v2293_v0  ;;  %v2502_v58 = vld [vmem:[%s2491_s17 + $0x8] sm:$0xff] }
  0x9a   : > { %v390_v1 = vsel %vm389_vm6, %v386_v62, %v388_v61  ;;  %v391_v0 = vsel %vm389_vm6, %v388_v61, %v386_v62  ;;  %3466 = vst [vmem:[#allocation5_spill] sm:$0xff] %v2502_v58 }
  0x9b   : > { %1991 = vmatprep.subr.bf16.mxu0 %v1990_v63  ;;  %v400_v11 = vmul.f32 %v2430_v8, %v390_v1  ;;  %v401_v20 = vmul.f32 %v2433_v9, %v391_v0  ;;  %v2506_v63 = vld [vmem:[%s2491_s17 + $0x18] sm:$0xff] }
  0x9c   : > { %1993 = vmatpush1.bf16.msra.mxu0 %v1992_v2  ;;  %3467 = vst [vmem:[#allocation6_spill] sm:$0xff] %v2506_v63 }
  0x9d   : > { %v407_v13 = vpop.permute.xlu1 %406  ;;  %v405_v18 = vpop.permute.xlu0 %404 }
  0x9e   : > { %v409_v19 = vsel %vm408_vm7, %v405_v18, %v407_v13  ;;  %v410_v10 = vsel %vm408_vm7, %v407_v13, %v405_v18 }
  0x9f   : > { %v419_v21 = vmul.f32 %v2437_v6, %v409_v19  ;;  %v420_v22 = vmul.f32 %v2440_v12, %v410_v10 }
  0xa1   : > { %v426_v25 = vpop.permute.xlu1 %425  ;;  %v424_v26 = vpop.permute.xlu0 %423  ;;  %v1994_v27 = vpack.c.bf16 %v420_v22, %v401_v20  ;;  %v1996_v28 = vpack.c.bf16 %v419_v21, %v400_v11 }
  0xa2   : > { %v428_v29 = vsel %vm427_vm8, %v424_v26, %v426_v25  ;;  %v429_v30 = vsel %vm427_vm8, %v426_v25, %v424_v26 }
  0xa3   : > { %v438_v33 = vmul.f32 %v2458_v23, %v428_v29  ;;  %v439_v34 = vmul.f32 %v2463_v24, %v429_v30  ;;  %1995 = vmatprep.subr.bf16.mxu0 %v1994_v27  ;;  %v2516_v27 = vld [vmem:[%s2491_s17 + $0x20] sm:$0xff]  ;;  %v2524_v29 = vld [vmem:[%s2491_s17 + $0x30] sm:$0xff] }
  0xa4   : > { %1997 = vmatpush1.bf16.msra.mxu0 %v1996_v28  ;;  %3468 = vst [vmem:[#allocation7_spill] sm:$0xff] %v2516_v27  ;;  %3469 = vst [vmem:[#allocation8_spill] sm:$0xff] %v2524_v29 }
  0xa5   : > { %v1998_v39 = vpack.c.bf16 %v472_v31, %v439_v34  ;;  %v2001_v40 = vpack.c.bf16 %v471_v32, %v438_v33 }
  0xa7   : > { %2000 = vmatprep.subr.msk.bf16.mxu0 %vm1999_vm11, %v1998_v39 }
  0xa8   : > { %2003 = vmatpush1.bf16.msk.msra.mxu0 %vm1999_vm11, %v2001_v40 }
  0xab   : > { %1946 = vmatmul.mubr.msk.f32.vlgmr.msra.gmra.mrb[0].mxu0 %vm473_vm12, %v449_v41 }
  0xac   : > { %563 = vmatprep.mubr.f32.mxu0 %v3451_v5 }
  0xaf   : > { %1947 = vmatmul.mubr.msk.f32.gmra.mrb[2].mxu0 %vm473_vm12, %v450_v42 }
  0xb0   : > { %569 = vmatprep.mubr.f32.mxu0 %v3451_v5 }
  0xb3   : > { %1948 = vmatmul.mubr.msk.f32.gmra.mrb[4].mxu0 %vm473_vm12, %v451_v43 }
  0xb4   : > { %575 = vmatprep.mubr.f32.mxu0 %v3451_v5 }
  0xb7   : > { %1949 = vmatmul.mubr.msk.f32.gmra.mrb[6].mxu0 %vm473_vm12, %v452_v44  ;;  %v2542_v44 = vld [vmem:[%s2491_s17 + $0x28] sm:$0xff] }
  0xb8   : > { %3470 = vst [vmem:[#allocation9_spill] sm:$0xff] %v2542_v44 }
 0x17e   : > { %v559_v48 = vpop.f32.mrb[0].mxu0 }
 0x17f   : > { %v560_v49 = vadd.f32 %v559_v48, %v2494_v47  ;;  %v561_v50 = vpop.f32.mrb[1].mxu0 }
 0x180   : > { %v562_v62 = vadd.f32 %v561_v50, %v2502_v58  ;;  %v2552_v50 = vld [vmem:[%s2491_s17 + $0x38] sm:$0xff] }
 0x181   : > { %v590_v52 = vmin.f32 %v560_v49, 0.0  ;;  %vm582_vm13 = vcmp.gt.f32.partialorder %v560_v49, 0.0  ;;  %3471 = vst [vmem:[#allocation10_spill] sm:$0xff] %v2552_v50 }
 0x182   : > { %v565_v53 = vpop.f32.mrb[2].mxu0  ;;  %v591_v0 = vmin.f32 %v562_v62, 0.0  ;;  %vm583_vm15 = vcmp.gt.f32.partialorder %v562_v62, 0.0 }
 0x183   : > { %v598_v54 = vmul.f32 1.442695, %v590_v52  ;;  %v566_v55 = vadd.f32 %v565_v53, %v2498_v51  ;;  %v567_v56 = vpop.f32.mrb[3].mxu0 }
 0x184   : > { %v568_v13 = vadd.f32 %v567_v56, %v2506_v63  ;;  %v600_v10 = vmul.f32 1.442695, %v591_v0 }
 0x185   : > { %2185 = vpow2.f32 %v598_v54  ;;  %v592_v57 = vmin.f32 %v566_v55, 0.0  ;;  %vm584_vm14 = vcmp.gt.f32.partialorder %v566_v55, 0.0 }
 0x186   : > { %v571_v59 = vpop.f32.mrb[4].mxu0  ;;  %v593_v11 = vmin.f32 %v568_v13, 0.0  ;;  %vm585_vm10 = vcmp.gt.f32.partialorder %v568_v13, 0.0 }
 0x187   : > { %v602_v60 = vmul.f32 1.442695, %v592_v57  ;;  %v573_v61 = vpop.f32.mrb[5].mxu0  ;;  %v572_v28 = vadd.f32 %v571_v59, %v2516_v27 }
 0x188   : > { %v604_v25 = vmul.f32 1.442695, %v593_v11  ;;  %v574_v48 = vadd.f32 %v573_v61, %v2542_v44  ;;  %v962_v11 = vld [vmem:[%s3448_s4 + $0x8] sm:$0xff] }
 0x189   : > { %2187 = vpow2.f32 %v602_v60  ;;  %v594_v30 = vmin.f32 %v572_v28, 0.0  ;;  %vm586_vm11 = vcmp.gt.f32.partialorder %v572_v28, 0.0  ;;  %1130 = vmatprep.mubr.f32.mxu1 %v962_v11 }
 0x18a   : > { %v577_v2 = vpop.f32.mrb[6].mxu0  ;;  %2189 = vpow2.f32 %v600_v10  ;;  %v595_v52 = vmin.f32 %v574_v48, 0.0 }
 0x18b   : > { %v579_v1 = vpop.f32.mrb[7].mxu0  ;;  %2191 = vpow2.f32 %v604_v25  ;;  %v578_v31 = vadd.f32 %v577_v2, %v2524_v29  ;;  %v606_v33 = vmul.f32 1.442695, %v594_v30 }
 0x18c   : > { %v580_v53 = vadd.f32 %v579_v1, %v2552_v50 }
 0x18d   : > { %v596_v34 = vmin.f32 %v578_v31, 0.0  ;;  %2193 = vpow2.f32 %v606_v33  ;;  %vm588_vm12 = vcmp.gt.f32.partialorder %v578_v31, 0.0 }
 0x18e   : > { %v597_v56 = vmin.f32 %v580_v53, 0.0 }
 0x18f   : > { %v2186_v18 = vpop.eup %2185  ;;  %v610_v41 = vmul.f32 1.442695, %v596_v34 }
 0x190   : > { %v1950_v19 = vadd.f32 -1.0, %v2186_v18  ;;  %v612_v60 = vmul.f32 1.442695, %v597_v56 }
 0x191   : > { %2195 = vpow2.f32 %v610_v41 }
 0x192   : > { %v2509_v20 = vsel %vm582_vm13, %v560_v49, %v1950_v19  ;;  %vm587_vm13 = vcmp.gt.f32.partialorder %v574_v48, 0.0 }
 0x193   : > { %v2188_v21 = vpop.eup %2187  ;;  %630 = vrot.lane.b32.xlu0 %v2509_v20, %s2232_s28 }
 0x194   : > { %v1952_v22 = vadd.f32 -1.0, %v2188_v21  ;;  %v2190_v32 = vpop.eup %2189 }
 0x195   : > { %v1951_v39 = vadd.f32 -1.0, %v2190_v32  ;;  %v2192_v40 = vpop.eup %2191  ;;  %v2670_v32 = vld [vmem:[#allocation2 + $0x240] sm:$0x1] }
 0x196   : > { %v2513_v26 = vsel %vm584_vm14, %v566_v55, %v1952_v22  ;;  %v1953_v43 = vadd.f32 -1.0, %v2192_v40  ;;  %v608_v55 = vmul.f32 1.442695, %v595_v52  ;;  %vm589_vm14 = vcmp.gt.f32.partialorder %v580_v53, 0.0  ;;  %3472 = vst [vmem:[#allocation11_spill] sm:$0xff] %v2670_v32 }
 0x197   : > { %632 = vrot.lane.b32.xlu1 %v2513_v26, %s2232_s28  ;;  %670 = vrot.lane.b32.xlu0 %v2509_v20, %s2231_s27  ;;  %v2539_v42 = vsel %vm583_vm15, %v562_v62, %v1951_v39  ;;  %v2194_v54 = vpop.eup %2193 }
 0x198   : > { %v2549_v49 = vsel %vm585_vm10, %v568_v13, %v1953_v43  ;;  %v1954_v57 = vadd.f32 -1.0, %v2194_v54  ;;  %2197 = vpow2.f32 %v608_v55 }
 0x199   : > { %2199 = vpow2.f32 %v612_v60 }
 0x19a   : > { %v2567_v61 = vsel %vm586_vm11, %v572_v28, %v1954_v57 }
 0x19b   : > { %672 = vrot.lane.b32.xlu1 %v2513_v26, %s2231_s27  ;;  %710 = vrot.lane.b32.xlu0 %v2509_v20, %s2233_s29  ;;  %v2196_v59 = vpop.eup %2195 }
 0x19c   : > { %v1956_v62 = vadd.f32 -1.0, %v2196_v59 }
 0x19e   : > { %v2573_v2 = vsel %vm588_vm12, %v578_v31, %v1956_v62  ;;  %v2668_v31 = vld [vmem:[#allocation2 + $0x248] sm:$0x1] }
 0x19f   : > { %712 = vrot.lane.b32.xlu1 %v2513_v26, %s2233_s29  ;;  %750 = vrot.lane.b32.xlu0 %v2509_v20, %s2235_s30  ;;  %1620 = vst.msk [vmem:[#allocation2 + $0x240] ss:$8 sm:$0x3] %vm2309_vm0, %v2234_v4  ;;  %vm1047_vm0 = vcmask 269312  }
 0x1a2   : > { %v2198_v1 = vpop.eup %2197 }
 0x1a3   : > { %752 = vrot.lane.b32.xlu1 %v2513_v26, %s2235_s30  ;;  %798 = vrot.lane.b32.xlu0 %v2509_v20, %s2236_s7  ;;  %v1955_v0 = vadd.f32 -1.0, %v2198_v1  ;;  %v2200_v13 = vpop.eup %2199 }
 0x1a4   : > { %v1957_v19 = vadd.f32 -1.0, %v2200_v13 }
 0x1a5   : > { %v2587_v18 = vsel %vm587_vm13, %v574_v48, %v1955_v0 }
 0x1a6   : > { %v2593_v10 = vsel %vm589_vm14, %v580_v53, %v1957_v19 }
 0x1a7   : > { %800 = vrot.lane.b32.xlu1 %v2513_v26, %s2236_s7  ;;  %638 = vrot.lane.b32.xlu0 %v2539_v42, %s2232_s28 }
 0x1ab   : > { %640 = vrot.lane.b32.xlu1 %v2549_v49, %s2232_s28  ;;  %678 = vrot.lane.b32.xlu0 %v2539_v42, %s2231_s27 }
 0x1af   : > { %680 = vrot.lane.b32.xlu1 %v2549_v49, %s2231_s27  ;;  %718 = vrot.lane.b32.xlu0 %v2539_v42, %s2233_s29 }
 0x1b3   : > { %720 = vrot.lane.b32.xlu1 %v2549_v49, %s2233_s29  ;;  %758 = vrot.lane.b32.xlu0 %v2539_v42, %s2235_s30 }
 0x1b7   : > { %760 = vrot.lane.b32.xlu1 %v2549_v49, %s2235_s30  ;;  %634 = vrot.lane.b32.xlu0 %v2567_v61, %s2232_s28 }
 0x1bb   : > { %636 = vrot.lane.b32.xlu1 %v2573_v2, %s2232_s28  ;;  %674 = vrot.lane.b32.xlu0 %v2567_v61, %s2231_s27 }
 0x1bf   : > { %676 = vrot.lane.b32.xlu1 %v2573_v2, %s2231_s27  ;;  %714 = vrot.lane.b32.xlu0 %v2567_v61, %s2233_s29 }
 0x1c3   : > { %716 = vrot.lane.b32.xlu1 %v2573_v2, %s2233_s29  ;;  %754 = vrot.lane.b32.xlu0 %v2567_v61, %s2235_s30 }
 0x1c7   : > { %756 = vrot.lane.b32.xlu1 %v2573_v2, %s2235_s30  ;;  %642 = vrot.lane.b32.xlu0 %v2587_v18, %s2232_s28 }
 0x1cb   : > { %644 = vrot.lane.b32.xlu1 %v2593_v10, %s2232_s28  ;;  %806 = vrot.lane.b32.xlu0 %v2539_v42, %s2236_s7 }
 0x1cf   : > { %808 = vrot.lane.b32.xlu1 %v2549_v49, %s2236_s7  ;;  %682 = vrot.lane.b32.xlu0 %v2587_v18, %s2231_s27 }
 0x1d3   : > { %684 = vrot.lane.b32.xlu1 %v2593_v10, %s2231_s27  ;;  %722 = vrot.lane.b32.xlu0 %v2587_v18, %s2233_s29 }
 0x1d7   : > { %804 = vrot.lane.b32.xlu1 %v2573_v2, %s2236_s7  ;;  %762 = vrot.lane.b32.xlu0 %v2587_v18, %s2235_s30 }
 0x1db   : > { %724 = vrot.lane.b32.xlu1 %v2593_v10, %s2233_s29  ;;  %802 = vrot.lane.b32.xlu0 %v2567_v61, %s2236_s7 }
 0x1df   : > { %840 = vrot.lane.b32.xlu1 %v2513_v26, %s2237_s8  ;;  %810 = vrot.lane.b32.xlu0 %v2587_v18, %s2236_s7 }
 0x1e3   : > { %764 = vrot.lane.b32.xlu1 %v2593_v10, %s2235_s30  ;;  %838 = vrot.lane.b32.xlu0 %v2509_v20, %s2237_s8 }
 0x1e7   : > { %848 = vrot.lane.b32.xlu1 %v2549_v49, %s2237_s8  ;;  %846 = vrot.lane.b32.xlu0 %v2539_v42, %s2237_s8 }
 0x1eb   : > { %844 = vrot.lane.b32.xlu1 %v2573_v2, %s2237_s8  ;;  %842 = vrot.lane.b32.xlu0 %v2567_v61, %s2237_s8 }
 0x1ef   : > { %880 = vrot.lane.b32.xlu1 %v2513_v26, %s2239_s9  ;;  %850 = vrot.lane.b32.xlu0 %v2587_v18, %s2237_s8 }
 0x1f3   : > { %812 = vrot.lane.b32.xlu1 %v2593_v10, %s2236_s7  ;;  %878 = vrot.lane.b32.xlu0 %v2509_v20, %s2239_s9 }
 0x1f7   : > { %888 = vrot.lane.b32.xlu1 %v2549_v49, %s2239_s9  ;;  %886 = vrot.lane.b32.xlu0 %v2539_v42, %s2239_s9 }
 0x1fb   : > { %852 = vrot.lane.b32.xlu1 %v2593_v10, %s2237_s8  ;;  %882 = vrot.lane.b32.xlu0 %v2567_v61, %s2239_s9 }
 0x1ff   : > { %884 = vrot.lane.b32.xlu1 %v2573_v2, %s2239_s9  ;;  %890 = vrot.lane.b32.xlu0 %v2587_v18, %s2239_s9 }
 0x203   : > { %892 = vrot.lane.b32.xlu1 %v2593_v10, %s2239_s9  ;;  %918 = vrot.lane.b32.xlu0 %v2509_v20, %s2240_s10 }
 0x205   : > { %v631_v21 = vpop.permute.xlu0 %630 }
 0x207   : > { %920 = vrot.lane.b32.xlu1 %v2513_v26, %s2240_s10  ;;  %926 = vrot.lane.b32.xlu0 %v2539_v42, %s2240_s10 }
 0x209   : > { %v633_v22 = vpop.permute.xlu1 %632  ;;  %v671_v25 = vpop.permute.xlu0 %670 }
 0x20b   : > { %928 = vrot.lane.b32.xlu1 %v2549_v49, %s2240_s10  ;;  %922 = vrot.lane.b32.xlu0 %v2567_v61, %s2240_s10 }
 0x20d   : > { %v673_v28 = vpop.permute.xlu1 %672  ;;  %v2666_v30 = vpop.permute.xlu0 %710 }
 0x20f   : > { %924 = vrot.lane.b32.xlu1 %v2573_v2, %s2240_s10  ;;  %930 = vrot.lane.b32.xlu0 %v2587_v18, %s2240_s10 }
 0x211   : > { %v2679_v33 = vpop.permute.xlu1 %712  ;;  %v2681_v34 = vpop.permute.xlu0 %750 }
 0x213   : > { %932 = vrot.lane.b32.xlu1 %v2593_v10, %s2240_s10 }
 0x215   : > { %v2685_v39 = vpop.permute.xlu1 %752  ;;  %v2687_v40 = vpop.permute.xlu0 %798 }
 0x219   : > { %v2689_v41 = vpop.permute.xlu1 %800  ;;  %v639_v3 = vpop.permute.xlu0 %638 }
 0x21a   : > { %v646_v4 = vsel %vm292_vm2, %v631_v21, %v639_v3  ;;  %v650_v43 = vsel %vm292_vm2, %v639_v3, %v631_v21 }
 0x21b   : > { %v654_v55 = vmul.f32 %v650_v43, %v2365_v16  ;;  %v655_v56 = vmul.f32 %v646_v4, %v2368_v17 }
 0x21d   : > { %v641_v48 = vpop.permute.xlu1 %640  ;;  %v679_v52 = vpop.permute.xlu0 %678 }
 0x21e   : > { %v647_v53 = vsel %vm292_vm2, %v633_v22, %v641_v48  ;;  %v651_v54 = vsel %vm292_vm2, %v641_v48, %v633_v22  ;;  %v690_v58 = vsel %vm311_vm1, %v679_v52, %v671_v25 }
 0x21f   : > { %v656_v57 = vmul.f32 %v651_v54, %v2365_v16  ;;  %v657_v59 = vmul.f32 %v647_v53, %v2368_v17 }
 0x221   : > { %v681_v60 = vpop.permute.xlu1 %680  ;;  %v719_v62 = vpop.permute.xlu0 %718  ;;  %v2004_v1 = vpack.c.bf16 %v657_v59, %v655_v56  ;;  %v2006_v0 = vpack.c.bf16 %v656_v57, %v654_v55 }
 0x222   : > { %v687_v55 = vsel %vm311_vm1, %v673_v28, %v681_v60  ;;  %v691_v50 = vsel %vm311_vm1, %v681_v60, %v673_v28 }
 0x223   : > { %2005 = vmatprep.subr.bf16.mxu1 %v2004_v1  ;;  %v686_v1 = vsel %vm311_vm1, %v671_v25, %v679_v52  ;;  %v697_v29 = vmul.f32 %v687_v55, %v2362_v15  ;;  %v696_v60 = vmul.f32 %v691_v50, %v2359_v14 }
 0x224   : > { %2007 = vmatpush1.bf16.msra.mxu1 %v2006_v0  ;;  %v695_v28 = vmul.f32 %v686_v1, %v2362_v15 }
 0x225   : > { %v721_v13 = vpop.permute.xlu1 %720  ;;  %v2703_v19 = vpop.permute.xlu0 %758 }
 0x229   : > { %v2705_v11 = vpop.permute.xlu1 %760  ;;  %v635_v21 = vpop.permute.xlu0 %634 }
 0x22d   : > { %v637_v22 = vpop.permute.xlu1 %636  ;;  %v675_v3 = vpop.permute.xlu0 %674 }
 0x231   : > { %v677_v43 = vpop.permute.xlu1 %676  ;;  %v715_v4 = vpop.permute.xlu0 %714 }
 0x235   : > { %v2707_v48 = vpop.permute.xlu1 %716  ;;  %v2709_v54 = vpop.permute.xlu0 %754 }
 0x239   : > { %v2711_v53 = vpop.permute.xlu1 %756  ;;  %v643_v56 = vpop.permute.xlu0 %642 }
 0x23a   : > { %v648_v57 = vsel %vm292_vm2, %v635_v21, %v643_v56  ;;  %v652_v59 = vsel %vm292_vm2, %v643_v56, %v635_v21 }
 0x23b   : > { %v658_v63 = vmul.f32 %v652_v59, %v2365_v16  ;;  %v659_v21 = vmul.f32 %v648_v57, %v2368_v17  ;;  %v694_v59 = vmul.f32 %v690_v58, %v2359_v14 }
 0x23d   : > { %v645_v0 = vpop.permute.xlu1 %644  ;;  %v2721_v5 = vpop.permute.xlu0 %806  ;;  %v2014_v58 = vpack.c.bf16 %v696_v60, %v694_v59 }
 0x23e   : > { %v649_v44 = vsel %vm292_vm2, %v637_v22, %v645_v0  ;;  %v653_v27 = vsel %vm292_vm2, %v645_v0, %v637_v22 }
 0x23f   : > { %v660_v56 = vmul.f32 %v653_v27, %v2365_v16  ;;  %v661_v51 = vmul.f32 %v649_v44, %v2368_v17  ;;  %v727_v27 = vsel %vm330_vm3, %v2679_v33, %v721_v13  ;;  %v2012_v44 = vpack.c.bf16 %v697_v29, %v695_v28 }
 0x240   : > { %v737_v29 = vmul.f32 %v727_v27, %v2391_v36  ;;  %v767_v27 = vsel %vm349_vm4, %v2685_v39, %v2705_v11 }
 0x241   : > { %v2738_v55 = vpop.permute.xlu1 %808  ;;  %v683_v47 = vpop.permute.xlu0 %682  ;;  %v2008_v32 = vpack.c.bf16 %v661_v51, %v659_v21  ;;  %v2010_v22 = vpack.c.bf16 %v660_v56, %v658_v63  ;;  %v726_v51 = vsel %vm330_vm3, %v2666_v30, %v719_v62 }
 0x242   : > { %v688_v25 = vsel %vm311_vm1, %v675_v3, %v683_v47  ;;  %v692_v52 = vsel %vm311_vm1, %v683_v47, %v675_v3 }
 0x243   : > { %2009 = vmatprep.subr.bf16.mxu1 %v2008_v32  ;;  %v731_v32 = vsel %vm330_vm3, %v721_v13, %v2679_v33  ;;  %v698_v3 = vmul.f32 %v692_v52, %v2359_v14  ;;  %v699_v1 = vmul.f32 %v688_v25, %v2362_v15  ;;  %v730_v33 = vsel %vm330_vm3, %v719_v62, %v2666_v30 }
 0x244   : > { %2011 = vmatpush1.bf16.msra.mxu1 %v2010_v22  ;;  %v735_v13 = vmul.f32 %v726_v51, %v2391_v36  ;;  %v736_v56 = vmul.f32 %v731_v32, %v2388_v35  ;;  %v734_v59 = vmul.f32 %v730_v33, %v2388_v35  ;;  %v766_v25 = vsel %vm349_vm4, %v2681_v34, %v2703_v19 }
 0x245   : > { %v685_v63 = vpop.permute.xlu1 %684  ;;  %v723_v50 = vpop.permute.xlu0 %722  ;;  %2013 = vmatprep.subr.bf16.mxu1 %v2012_v44  ;;  %v777_v32 = vmul.f32 %v767_v27, %v2397_v38 }
 0x246   : > { %v689_v57 = vsel %vm311_vm1, %v677_v43, %v685_v63  ;;  %v693_v47 = vsel %vm311_vm1, %v685_v63, %v677_v43  ;;  %v2020_v44 = vpack.c.bf16 %v737_v29, %v735_v13  ;;  %v728_v30 = vsel %vm330_vm3, %v715_v4, %v723_v50 }
 0x247   : > { %v700_v0 = vmul.f32 %v693_v47, %v2359_v14  ;;  %v701_v21 = vmul.f32 %v689_v57, %v2362_v15  ;;  %v732_v62 = vsel %vm330_vm3, %v723_v50, %v715_v4  ;;  %v2022_v63 = vpack.c.bf16 %v736_v56, %v734_v59 }
 0x248   : > { %2015 = vmatpush1.bf16.msra.mxu1 %v2014_v58  ;;  %v771_v58 = vsel %vm349_vm4, %v2705_v11, %v2685_v39  ;;  %v738_v29 = vmul.f32 %v732_v62, %v2388_v35  ;;  %v739_v57 = vmul.f32 %v728_v30, %v2391_v36  ;;  %v770_v39 = vsel %vm349_vm4, %v2703_v19, %v2681_v34 }
 0x249   : > { %v2768_v28 = vpop.permute.xlu1 %804  ;;  %v763_v43 = vpop.permute.xlu0 %762  ;;  %v2016_v60 = vpack.c.bf16 %v701_v21, %v699_v1  ;;  %v2018_v22 = vpack.c.bf16 %v700_v0, %v698_v3  ;;  %v775_v11 = vmul.f32 %v766_v25, %v2397_v38  ;;  %v776_v33 = vmul.f32 %v771_v58, %v2394_v37 }
 0x24a   : > { %v774_v56 = vmul.f32 %v770_v39, %v2394_v37  ;;  %v772_v34 = vsel %vm349_vm4, %v763_v43, %v2709_v54 }
 0x24b   : > { %2017 = vmatprep.subr.bf16.mxu1 %v2016_v60  ;;  %v2028_v13 = vpack.c.bf16 %v777_v32, %v775_v11  ;;  %v768_v60 = vsel %vm349_vm4, %v2709_v54, %v763_v43  ;;  %v778_v30 = vmul.f32 %v772_v34, %v2394_v37  ;;  %v2036_v32 = vpack.c.bf16 %v2549_v49, %v2539_v42 }
 0x24c   : > { %2019 = vmatpush1.bf16.msra.mxu1 %v2018_v22  ;;  %v779_v62 = vmul.f32 %v768_v60, %v2397_v38  ;;  %v2038_v42 = vpack.c.bf16 %v2513_v26, %v2509_v20 }
 0x24d   : > { %v725_v52 = vpop.permute.xlu1 %724  ;;  %v803_v51 = vpop.permute.xlu0 %802  ;;  %2021 = vmatprep.subr.bf16.mxu1 %v2020_v44  ;;  %v2030_v44 = vpack.c.bf16 %v776_v33, %v774_v56 }
 0x24e   : > { %v729_v4 = vsel %vm330_vm3, %v2707_v48, %v725_v52  ;;  %v733_v50 = vsel %vm330_vm3, %v725_v52, %v2707_v48 }
 0x24f   : > { %v740_v47 = vmul.f32 %v733_v50, %v2388_v35  ;;  %v741_v3 = vmul.f32 %v729_v4, %v2391_v36 }
 0x250   : > { %2023 = vmatpush1.bf16.msra.mxu1 %v2022_v63 }
 0x251   : > { %v841_v1 = vpop.permute.xlu1 %840  ;;  %v811_v0 = vpop.permute.xlu0 %810  ;;  %v2024_v21 = vpack.c.bf16 %v741_v3, %v739_v57  ;;  %v2026_v48 = vpack.c.bf16 %v740_v47, %v738_v29  ;;  %v818_v29 = vsel %vm370_vm5, %v2721_v5, %v2687_v40  ;;  %v815_v57 = vsel %vm370_vm5, %v2689_v41, %v2738_v55 }
 0x252   : > { %v2040_v47 = vpack.c.bf16 %v2593_v10, %v2587_v18  ;;  %v814_v3 = vsel %vm370_vm5, %v2687_v40, %v2721_v5  ;;  %v823_v39 = vmul.f32 %v818_v29, %v2412_v46  ;;  %v824_v11 = vmul.f32 %v815_v57, %v2409_v45 }
 0x253   : > { %2025 = vmatprep.subr.bf16.mxu1 %v2024_v21  ;;  %v816_v20 = vsel %vm370_vm5, %v803_v51, %v811_v0  ;;  %v820_v26 = vsel %vm370_vm5, %v811_v0, %v803_v51  ;;  %v2042_v18 = vpack.c.bf16 %v2573_v2, %v2567_v61  ;;  %v822_v10 = vmul.f32 %v814_v3, %v2409_v45 }
 0x254   : > { %2027 = vmatpush1.bf16.msra.mxu1 %v2026_v48  ;;  %v826_v48 = vmul.f32 %v816_v20, %v2409_v45  ;;  %v827_v33 = vmul.f32 %v820_v26, %v2412_v46 }
 0x255   : > { %v765_v19 = vpop.permute.xlu1 %764  ;;  %v839_v22 = vpop.permute.xlu0 %838  ;;  %2029 = vmatprep.subr.bf16.mxu1 %v2028_v13  ;;  %v2046_v51 = vpack.c.bf16 %v824_v11, %v822_v10 }
 0x256   : > { %v769_v59 = vsel %vm349_vm4, %v2711_v53, %v765_v19  ;;  %v773_v27 = vsel %vm349_vm4, %v765_v19, %v2711_v53  ;;  %v819_v53 = vsel %vm370_vm5, %v2738_v55, %v2689_v41 }
 0x257   : > { %v780_v25 = vmul.f32 %v773_v27, %v2394_v37  ;;  %v781_v54 = vmul.f32 %v769_v59, %v2397_v38  ;;  %v825_v49 = vmul.f32 %v819_v53, %v2412_v46 }
 0x258   : > { %2031 = vmatpush1.bf16.msra.mxu1 %v2030_v44 }
 0x259   : > { %v849_v43 = vpop.permute.xlu1 %848  ;;  %v847_v52 = vpop.permute.xlu0 %846  ;;  %v2032_v63 = vpack.c.bf16 %v781_v54, %v779_v62  ;;  %v2034_v58 = vpack.c.bf16 %v780_v25, %v778_v30  ;;  %v2044_v5 = vpack.c.bf16 %v825_v49, %v823_v39 }
 0x25a   : > { %v859_v40 = vsel %vm389_vm6, %v849_v43, %v841_v1  ;;  %v858_v55 = vsel %vm389_vm6, %v847_v52, %v839_v22  ;;  %v855_v61 = vsel %vm389_vm6, %v841_v1, %v849_v43  ;;  %v854_v2 = vsel %vm389_vm6, %v839_v22, %v847_v52 }
 0x25b   : > { %2033 = vmatprep.subr.bf16.mxu1 %v2032_v63  ;;  %v865_v34 = vmul.f32 %v859_v40, %v2433_v9  ;;  %v863_v19 = vmul.f32 %v858_v55, %v2433_v9  ;;  %v864_v1 = vmul.f32 %v855_v61, %v2430_v8  ;;  %v862_v22 = vmul.f32 %v854_v2, %v2430_v8 }
 0x25c   : > { %2035 = vmatpush1.bf16.msra.mxu1 %v2034_v58 }
 0x25d   : > { %v845_v4 = vpop.permute.xlu1 %844  ;;  %v843_v50 = vpop.permute.xlu0 %842  ;;  %2037 = vmatprep.subr.bf16.mxu1 %v2036_v32  ;;  %v2052_v43 = vpack.c.bf16 %v865_v34, %v863_v19  ;;  %v2054_v57 = vpack.c.bf16 %v864_v1, %v862_v22 }
 0x260   : > { %2039 = vmatpush1.bf16.msra.mxu1 %v2038_v42 }
 0x261   : > { %v881_v21 = vpop.permute.xlu1 %880  ;;  %v851_v41 = vpop.permute.xlu0 %850  ;;  %2041 = vmatprep.subr.bf16.mxu1 %v2040_v47 }
 0x262   : > { %v860_v54 = vsel %vm389_vm6, %v851_v41, %v843_v50 }
 0x263   : > { %v867_v32 = vmul.f32 %v860_v54, %v2433_v9 }
 0x264   : > { %2043 = vmatpush1.bf16.msra.mxu1 %v2042_v18 }
 0x265   : > { %v813_v13 = vpop.permute.xlu1 %812  ;;  %v879_v56 = vpop.permute.xlu0 %878  ;;  %2045 = vmatprep.subr.bf16.mxu1 %v2044_v5 }
 0x266   : > { %v817_v0 = vsel %vm370_vm5, %v2768_v28, %v813_v13  ;;  %v821_v60 = vsel %vm370_vm5, %v813_v13, %v2768_v28  ;;  %v856_v28 = vsel %vm389_vm6, %v843_v50, %v851_v41 }
 0x267   : > { %v828_v59 = vmul.f32 %v817_v0, %v2409_v45  ;;  %v829_v27 = vmul.f32 %v821_v60, %v2412_v46  ;;  %v866_v58 = vmul.f32 %v856_v28, %v2430_v8 }
 0x268   : > { %2047 = vmatpush1.bf16.msra.mxu1 %v2046_v51 }
 0x269   : > { %v889_v44 = vpop.permute.xlu1 %888  ;;  %v887_v30 = vpop.permute.xlu0 %886  ;;  %v2048_v62 = vpack.c.bf16 %v829_v27, %v827_v33  ;;  %v2050_v25 = vpack.c.bf16 %v828_v59, %v826_v48 }
 0x26a   : > { %v899_v52 = vsel %vm408_vm7, %v889_v44, %v881_v21  ;;  %v898_v63 = vsel %vm408_vm7, %v887_v30, %v879_v56  ;;  %v895_v50 = vsel %vm408_vm7, %v881_v21, %v889_v44  ;;  %v894_v42 = vsel %vm408_vm7, %v879_v56, %v887_v30  ;;  %v961_v44 = vld [vmem:[%s3448_s4] sm:$0xff] }
 0x26b   : > { %2049 = vmatprep.subr.bf16.mxu1 %v2048_v62  ;;  %v905_v3 = vmul.f32 %v899_v52, %v2440_v12  ;;  %v903_v39 = vmul.f32 %v898_v63, %v2440_v12  ;;  %v904_v10 = vmul.f32 %v895_v50, %v2437_v6  ;;  %v902_v5 = vmul.f32 %v894_v42, %v2437_v6  ;;  %v968_v42 = vld [vmem:[%s3448_s4 + $0x38] sm:$0xff] }
 0x26c   : > { %2051 = vmatpush1.bf16.msra.mxu1 %v2050_v25  ;;  %v965_v25 = vld [vmem:[%s3448_s4 + $0x20] sm:$0xff] }
 0x26d   : > { %v853_v53 = vpop.permute.xlu1 %852  ;;  %v883_v29 = vpop.permute.xlu0 %882  ;;  %2053 = vmatprep.subr.bf16.mxu1 %v2052_v43  ;;  %v2060_v40 = vpack.c.bf16 %v905_v3, %v903_v39  ;;  %v2062_v51 = vpack.c.bf16 %v904_v10, %v902_v5  ;;  %v967_v3 = vld [vmem:[%s3448_s4 + $0x30] sm:$0xff]  ;;  %v970_v5 = vld [vmem:[%s3448_s4 + $0x48] sm:$0xff] }
 0x26e   : > { %v857_v49 = vsel %vm389_vm6, %v845_v4, %v853_v53  ;;  %v861_v47 = vsel %vm389_vm6, %v853_v53, %v845_v4 }
 0x26f   : > { %v868_v11 = vmul.f32 %v857_v49, %v2430_v8  ;;  %v869_v41 = vmul.f32 %v861_v47, %v2433_v9 }
 0x270   : > { %2055 = vmatpush1.bf16.msra.mxu1 %v2054_v57 }
 0x271   : > { %v885_v20 = vpop.permute.xlu1 %884  ;;  %v891_v21 = vpop.permute.xlu0 %890  ;;  %v2056_v26 = vpack.c.bf16 %v869_v41, %v867_v32  ;;  %v2058_v18 = vpack.c.bf16 %v868_v11, %v866_v58  ;;  %v964_v32 = vld [vmem:[%s3448_s4 + $0x18] sm:$0xff]  ;;  %v971_v11 = vld [vmem:[%s3448_s4 + $0x50] sm:$0xff] }
 0x272   : > { %v896_v4 = vsel %vm408_vm7, %v883_v29, %v891_v21  ;;  %v900_v55 = vsel %vm408_vm7, %v891_v21, %v883_v29 }
 0x273   : > { %2057 = vmatprep.subr.bf16.mxu1 %v2056_v26  ;;  %v906_v61 = vmul.f32 %v896_v4, %v2437_v6  ;;  %v907_v2 = vmul.f32 %v900_v55, %v2440_v12  ;;  %v3473_v55 = vmov 0.0  }
 0x274   : > { %2059 = vmatpush1.bf16.msra.mxu1 %v2058_v18 }
 0x275   : > { %v893_v48 = vpop.permute.xlu1 %892  ;;  %v919_v33 = vpop.permute.xlu0 %918  ;;  %2061 = vmatprep.subr.bf16.mxu1 %v2060_v40 }
 0x276   : > { %v897_v13 = vsel %vm408_vm7, %v885_v20, %v893_v48  ;;  %v901_v56 = vsel %vm408_vm7, %v893_v48, %v885_v20  ;;  %v966_v48 = vld [vmem:[%s3448_s4 + $0x28] sm:$0xff] }
 0x277   : > { %v908_v0 = vmul.f32 %v897_v13, %v2437_v6  ;;  %v909_v60 = vmul.f32 %v901_v56, %v2440_v12  ;;  %v3475_v56 = vld [vmem:[#allocation3_spill] sm:$0xff] }
 0x278   : > { %2063 = vmatpush1.bf16.msra.mxu1 %v2062_v51 }
 0x279   : > { %v921_v34 = vpop.permute.xlu1 %920  ;;  %v927_v19 = vpop.permute.xlu0 %926  ;;  %v2064_v59 = vpack.c.bf16 %v909_v60, %v907_v2  ;;  %v2066_v27 = vpack.c.bf16 %v908_v0, %v906_v61  ;;  %v3476_v2 = vld [vmem:[#allocation5_spill] sm:$0xff] }
 0x27a   : > { %v934_v1 = vsel %vm427_vm8, %v919_v33, %v927_v19  ;;  %v938_v22 = vsel %vm427_vm8, %v927_v19, %v919_v33  ;;  %v972_v33 = vld [vmem:[%s3448_s4 + $0x58] sm:$0xff] }
 0x27b   : > { %2065 = vmatprep.subr.bf16.mxu1 %v2064_v59  ;;  %v942_v43 = vmul.f32 %v2458_v23, %v934_v1  ;;  %v943_v52 = vmul.f32 %v2463_v24, %v938_v22 }
 0x27c   : > { %2067 = vmatpush1.bf16.msra.mxu1 %v2066_v27  ;;  %v3477_v27 = vld [vmem:[#allocation4_spill] sm:$0xff] }
 0x27d   : > { %v929_v30 = vpop.permute.xlu1 %928  ;;  %v923_v62 = vpop.permute.xlu0 %922 }
 0x27e   : > { %v935_v28 = vsel %vm427_vm8, %v921_v34, %v929_v30  ;;  %v939_v54 = vsel %vm427_vm8, %v929_v30, %v921_v34  ;;  %v3478_v30 = vld [vmem:[#allocation6_spill] sm:$0xff] }
 0x27f   : > { %v944_v63 = vmul.f32 %v2458_v23, %v935_v28  ;;  %v945_v58 = vmul.f32 %v2463_v24, %v939_v54  ;;  %1131 = vmatmul.mubr.f32.vlgmr.msra.gmra.mrb[0].mxu1 %v961_v44 }
 0x280   : > { %1136 = vmatprep.mubr.f32.mxu1 %v965_v25 }
 0x281   : > { %v925_v53 = vpop.permute.xlu1 %924  ;;  %v931_v29 = vpop.permute.xlu0 %930  ;;  %v2068_v57 = vpack.c.bf16 %v945_v58, %v943_v52  ;;  %v2070_v50 = vpack.c.bf16 %v944_v63, %v942_v43  ;;  %v3479_v52 = vld [vmem:[#allocation7_spill] sm:$0xff] }
 0x282   : > { %v936_v49 = vsel %vm427_vm8, %v923_v62, %v931_v29  ;;  %v940_v47 = vsel %vm427_vm8, %v931_v29, %v923_v62 }
 0x283   : > { %2069 = vmatprep.subr.bf16.mxu1 %v2068_v57  ;;  %1137 = vmatmul.mubr.f32.gmra.mrb[2].mxu1 %v964_v32  ;;  %v946_v21 = vmul.f32 %v2458_v23, %v936_v49  ;;  %v947_v26 = vmul.f32 %v2463_v24, %v940_v47  ;;  %v3481_v47 = vld [vmem:[#allocation8_spill] sm:$0xff] }
 0x284   : > { %2071 = vmatpush1.bf16.msra.mxu1 %v2070_v50  ;;  %1142 = vmatprep.mubr.f32.mxu1 %v968_v42 }
 0x285   : > { %v933_v39 = vpop.permute.xlu1 %932 }
 0x286   : > { %v937_v41 = vsel %vm427_vm8, %v925_v53, %v933_v39  ;;  %v941_v20 = vsel %vm427_vm8, %v933_v39, %v925_v53  ;;  %v3480_v53 = vld [vmem:[#allocation9_spill] sm:$0xff] }
 0x287   : > { %v948_v18 = vmul.f32 %v2458_v23, %v937_v41  ;;  %v949_v10 = vmul.f32 %v2463_v24, %v941_v20  ;;  %1143 = vmatmul.mubr.f32.gmra.mrb[4].mxu1 %v967_v3  ;;  %v963_v23 = vld [vmem:[%s3448_s4 + $0x10] sm:$0xff]  ;;  %v3482_v41 = vld [vmem:[#allocation10_spill] sm:$0xff] }
 0x288   : > { %1148 = vmatprep.mubr.f32.mxu1 %v971_v11  ;;  %v3474_v24 = vld [vmem:[#allocation11_spill] sm:$0xff] }
 0x289   : > { %v2072_v40 = vpack.c.bf16 %v949_v10, %v947_v26  ;;  %v2074_v4 = vpack.c.bf16 %v948_v18, %v946_v21 }
 0x28b   : > { %2073 = vmatprep.subr.bf16.mxu1 %v2072_v40  ;;  %1149 = vmatmul.mubr.f32.gmra.mrb[6].mxu1 %v970_v5 }
 0x28c   : > { %2075 = vmatpush1.bf16.msra.mxu1 %v2074_v4  ;;  %1219 = vmatprep.mubr.f32.mxu1 %v3473_v55 }
 0x28d   : > { %1958 = vmatprep.subr.msk.mxu1 %vm486_vm9, %v2668_v31  ;;  %v969_v31 = vld [vmem:[%s3448_s4 + $0x40] sm:$0xff] }
 0x290   : > { %1959 = vmatpush1.msk.msra.mxu1 %vm486_vm9, %v3474_v24 }
 0x291   : > { %1960 = vmatmul.mubr.msk.f32.vlgmr.msra.gmra.mrb[0].mxu1 %vm1047_vm0, %v963_v23 }
 0x292   : > { %1225 = vmatprep.mubr.f32.mxu1 %v3473_v55 }
 0x295   : > { %1961 = vmatmul.mubr.msk.f32.gmra.mrb[2].mxu1 %vm1047_vm0, %v966_v48 }
 0x296   : > { %1231 = vmatprep.mubr.f32.mxu1 %v3473_v55 }
 0x299   : > { %1962 = vmatmul.mubr.msk.f32.gmra.mrb[4].mxu1 %vm1047_vm0, %v969_v31 }
 0x29a   : > { %1237 = vmatprep.mubr.f32.mxu1 %v3473_v55 }
 0x29d   : > { %1963 = vmatmul.mubr.msk.f32.gmra.mrb[6].mxu1 %vm1047_vm0, %v972_v33 }
 0x364   : > { %v1221_v13 = vpop.f32.mrb[0].mxu1 }
 0x365   : > { %v2148_v51 = vadd.f32 %v1221_v13, %v3475_v56  ;;  %v1223_v61 = vpop.f32.mrb[1].mxu1 }
 0x366   : > { %v2149_v0 = vadd.f32 %v1223_v61, %v3476_v2 }
 0x367   : > { %v1252_v60 = vmin.f32 %v2148_v51, 0.0  ;;  %vm1244_vm15 = vcmp.gt.f32.partialorder %v2148_v51, 0.0 }
 0x368   : > { %v1253_v34 = vmin.f32 %v2149_v0, 0.0  ;;  %v1227_v19 = vpop.f32.mrb[2].mxu1  ;;  %vm1245_vm10 = vcmp.gt.f32.partialorder %v2149_v0, 0.0 }
 0x369   : > { %v1260_v59 = vmul.f32 1.442695, %v1252_v60  ;;  %v2150_v1 = vadd.f32 %v1227_v19, %v3477_v27  ;;  %v1229_v22 = vpop.f32.mrb[3].mxu1 }
 0x36a   : > { %v1262_v44 = vmul.f32 1.442695, %v1253_v34  ;;  %v2151_v62 = vadd.f32 %v1229_v22, %v3478_v30 }
 0x36b   : > { %2201 = vpow2.f32 %v1260_v59  ;;  %v1254_v25 = vmin.f32 %v2150_v1, 0.0  ;;  %vm1246_vm11 = vcmp.gt.f32.partialorder %v2150_v1, 0.0 }
 0x36c   : > { %2203 = vpow2.f32 %v1262_v44  ;;  %v1255_v28 = vmin.f32 %v2151_v62, 0.0  ;;  %v1233_v54 = vpop.f32.mrb[4].mxu1  ;;  %vm1247_vm12 = vcmp.gt.f32.partialorder %v2151_v62, 0.0 }
 0x36d   : > { %v1264_v43 = vmul.f32 1.442695, %v1254_v25  ;;  %v2152_v63 = vadd.f32 %v1233_v54, %v3479_v52  ;;  %v1235_v58 = vpop.f32.mrb[5].mxu1 }
 0x36e   : > { %v1266_v32 = vmul.f32 1.442695, %v1255_v28  ;;  %v2153_v29 = vadd.f32 %v1235_v58, %v3480_v53  ;;  %v1623_v28 = vld [vmem:[%s3449_s5 + $0x8] sm:$0xff] }
 0x36f   : > { %2205 = vpow2.f32 %v1264_v43  ;;  %v1256_v57 = vmin.f32 %v2152_v63, 0.0  ;;  %vm1248_vm13 = vcmp.gt.f32.partialorder %v2152_v63, 0.0  ;;  %1772 = vmatprep.mubr.f32.mxu0 %v1623_v28 }
 0x370   : > { %2207 = vpow2.f32 %v1266_v32  ;;  %v1257_v50 = vmin.f32 %v2153_v29, 0.0  ;;  %v1239_v42 = vpop.f32.mrb[6].mxu1  ;;  %vm1249_vm14 = vcmp.gt.f32.partialorder %v2153_v29, 0.0 }
 0x371   : > { %v1268_v49 = vmul.f32 1.442695, %v1256_v57  ;;  %v2154_v3 = vadd.f32 %v1239_v42, %v3481_v47  ;;  %v1241_v39 = vpop.f32.mrb[7].mxu1 }
 0x372   : > { %v1270_v11 = vmul.f32 1.442695, %v1257_v50  ;;  %v2155_v20 = vadd.f32 %v1241_v39, %v3482_v41 }
 0x373   : > { %2209 = vpow2.f32 %v1268_v49  ;;  %v1258_v21 = vmin.f32 %v2154_v3, 0.0 }
 0x374   : > { %2211 = vpow2.f32 %v1270_v11  ;;  %v1259_v26 = vmin.f32 %v2155_v20, 0.0 }
 0x375   : > { %v2202_v18 = vpop.eup %2201  ;;  %v1272_v10 = vmul.f32 1.442695, %v1258_v21 }
 0x376   : > { %v2204_v5 = vpop.eup %2203  ;;  %v1964_v40 = vadd.f32 -1.0, %v2202_v18  ;;  %v1274_v4 = vmul.f32 1.442695, %v1259_v26 }
 0x377   : > { %v1965_v23 = vadd.f32 -1.0, %v2204_v5  ;;  %2213 = vpow2.f32 %v1272_v10 }
 0x378   : > { %v2988_v24 = vsel %vm1244_vm15, %v2148_v51, %v1964_v40  ;;  %2215 = vpow2.f32 %v1274_v4  ;;  %vm1250_vm15 = vcmp.gt.f32.partialorder %v2154_v3, 0.0 }
 0x379   : > { %v2206_v48 = vpop.eup %2205  ;;  %v2990_v31 = vsel %vm1245_vm10, %v2149_v0, %v1965_v23  ;;  %1292 = vrot.lane.b32.xlu0 %v2988_v24, %s2232_s28  ;;  %vm1251_vm10 = vcmp.gt.f32.partialorder %v2155_v20, 0.0 }
 0x37a   : > { %v2208_v33 = vpop.eup %2207  ;;  %v1966_v13 = vadd.f32 -1.0, %v2206_v48 }
 0x37b   : > { %v1967_v56 = vadd.f32 -1.0, %v2208_v33 }
 0x37c   : > { %v2994_v61 = vsel %vm1246_vm11, %v2150_v1, %v1966_v13 }
 0x37d   : > { %v2210_v2 = vpop.eup %2209  ;;  %v2996_v60 = vsel %vm1247_vm12, %v2151_v62, %v1967_v56  ;;  %1294 = vrot.lane.b32.xlu1 %v2994_v61, %s2232_s28  ;;  %1332 = vrot.lane.b32.xlu0 %v2988_v24, %s2231_s27 }
 0x37e   : > { %v2212_v51 = vpop.eup %2211  ;;  %v1968_v0 = vadd.f32 -1.0, %v2210_v2 }
 0x37f   : > { %v1969_v34 = vadd.f32 -1.0, %v2212_v51 }
 0x380   : > { %v3002_v19 = vsel %vm1248_vm13, %v2152_v63, %v1968_v0 }
 0x381   : > { %v2214_v59 = vpop.eup %2213  ;;  %v3004_v27 = vsel %vm1249_vm14, %v2153_v29, %v1969_v34  ;;  %1334 = vrot.lane.b32.xlu1 %v2994_v61, %s2231_s27  ;;  %1372 = vrot.lane.b32.xlu0 %v2988_v24, %s2233_s29 }
 0x382   : > { %v2216_v1 = vpop.eup %2215  ;;  %v1970_v22 = vadd.f32 -1.0, %v2214_v59 }
 0x383   : > { %v1971_v44 = vadd.f32 -1.0, %v2216_v1 }
 0x384   : > { %v3010_v30 = vsel %vm1250_vm15, %v2154_v3, %v1970_v22 }
 0x385   : > { %v3012_v62 = vsel %vm1251_vm10, %v2155_v20, %v1971_v44  ;;  %1374 = vrot.lane.b32.xlu1 %v2994_v61, %s2233_s29  ;;  %1412 = vrot.lane.b32.xlu0 %v2988_v24, %s2235_s30 }
 0x389   : > { %1414 = vrot.lane.b32.xlu1 %v2994_v61, %s2235_s30  ;;  %1460 = vrot.lane.b32.xlu0 %v2988_v24, %s2236_s7 }
 0x38d   : > { %1462 = vrot.lane.b32.xlu1 %v2994_v61, %s2236_s7  ;;  %1300 = vrot.lane.b32.xlu0 %v2990_v31, %s2232_s28 }
 0x391   : > { %1302 = vrot.lane.b32.xlu1 %v2996_v60, %s2232_s28  ;;  %1340 = vrot.lane.b32.xlu0 %v2990_v31, %s2231_s27 }
 0x395   : > { %1342 = vrot.lane.b32.xlu1 %v2996_v60, %s2231_s27  ;;  %1380 = vrot.lane.b32.xlu0 %v2990_v31, %s2233_s29 }
 0x399   : > { %1382 = vrot.lane.b32.xlu1 %v2996_v60, %s2233_s29  ;;  %1420 = vrot.lane.b32.xlu0 %v2990_v31, %s2235_s30 }
 0x39d   : > { %1422 = vrot.lane.b32.xlu1 %v2996_v60, %s2235_s30  ;;  %1468 = vrot.lane.b32.xlu0 %v2990_v31, %s2236_s7 }
 0x3a1   : > { %1470 = vrot.lane.b32.xlu1 %v2996_v60, %s2236_s7  ;;  %1296 = vrot.lane.b32.xlu0 %v3002_v19, %s2232_s28 }
 0x3a5   : > { %1298 = vrot.lane.b32.xlu1 %v3010_v30, %s2232_s28  ;;  %1336 = vrot.lane.b32.xlu0 %v3002_v19, %s2231_s27 }
 0x3a9   : > { %1338 = vrot.lane.b32.xlu1 %v3010_v30, %s2231_s27  ;;  %1376 = vrot.lane.b32.xlu0 %v3002_v19, %s2233_s29 }
 0x3ad   : > { %1378 = vrot.lane.b32.xlu1 %v3010_v30, %s2233_s29  ;;  %1416 = vrot.lane.b32.xlu0 %v3002_v19, %s2235_s30 }
 0x3b1   : > { %1418 = vrot.lane.b32.xlu1 %v3010_v30, %s2235_s30  ;;  %1464 = vrot.lane.b32.xlu0 %v3002_v19, %s2236_s7 }
 0x3b5   : > { %1466 = vrot.lane.b32.xlu1 %v3010_v30, %s2236_s7  ;;  %1304 = vrot.lane.b32.xlu0 %v3004_v27, %s2232_s28 }
 0x3b9   : > { %1306 = vrot.lane.b32.xlu1 %v3012_v62, %s2232_s28  ;;  %1500 = vrot.lane.b32.xlu0 %v2988_v24, %s2237_s8 }
 0x3bd   : > { %1502 = vrot.lane.b32.xlu1 %v2994_v61, %s2237_s8  ;;  %1344 = vrot.lane.b32.xlu0 %v3004_v27, %s2231_s27 }
 0x3c1   : > { %1346 = vrot.lane.b32.xlu1 %v3012_v62, %s2231_s27  ;;  %1384 = vrot.lane.b32.xlu0 %v3004_v27, %s2233_s29 }
 0x3c5   : > { %1510 = vrot.lane.b32.xlu1 %v2996_v60, %s2237_s8  ;;  %1424 = vrot.lane.b32.xlu0 %v3004_v27, %s2235_s30 }
 0x3c9   : > { %1386 = vrot.lane.b32.xlu1 %v3012_v62, %s2233_s29  ;;  %1472 = vrot.lane.b32.xlu0 %v3004_v27, %s2236_s7 }
 0x3cd   : > { %1506 = vrot.lane.b32.xlu1 %v3010_v30, %s2237_s8  ;;  %1508 = vrot.lane.b32.xlu0 %v2990_v31, %s2237_s8 }
 0x3d1   : > { %1426 = vrot.lane.b32.xlu1 %v3012_v62, %s2235_s30  ;;  %1504 = vrot.lane.b32.xlu0 %v3002_v19, %s2237_s8 }
 0x3d5   : > { %1542 = vrot.lane.b32.xlu1 %v2994_v61, %s2239_s9  ;;  %1512 = vrot.lane.b32.xlu0 %v3004_v27, %s2237_s8 }
 0x3d9   : > { %1550 = vrot.lane.b32.xlu1 %v2996_v60, %s2239_s9  ;;  %1540 = vrot.lane.b32.xlu0 %v2988_v24, %s2239_s9 }
 0x3dd   : > { %1546 = vrot.lane.b32.xlu1 %v3010_v30, %s2239_s9  ;;  %1548 = vrot.lane.b32.xlu0 %v2990_v31, %s2239_s9 }
 0x3e1   : > { %1474 = vrot.lane.b32.xlu1 %v3012_v62, %s2236_s7  ;;  %1544 = vrot.lane.b32.xlu0 %v3002_v19, %s2239_s9 }
 0x3e5   : > { %1582 = vrot.lane.b32.xlu1 %v2994_v61, %s2240_s10  ;;  %1552 = vrot.lane.b32.xlu0 %v3004_v27, %s2239_s9 }
 0x3e9   : > { %1514 = vrot.lane.b32.xlu1 %v3012_v62, %s2237_s8  ;;  %1580 = vrot.lane.b32.xlu0 %v2988_v24, %s2240_s10 }
 0x3eb   : > { %v1293_v25 = vpop.permute.xlu0 %1292 }
 0x3ed   : > { %1590 = vrot.lane.b32.xlu1 %v2996_v60, %s2240_s10  ;;  %1588 = vrot.lane.b32.xlu0 %v2990_v31, %s2240_s10 }
 0x3ef   : > { %v1295_v54 = vpop.permute.xlu1 %1294  ;;  %v1333_v43 = vpop.permute.xlu0 %1332 }
 0x3f1   : > { %1554 = vrot.lane.b32.xlu1 %v3012_v62, %s2239_s9  ;;  %1584 = vrot.lane.b32.xlu0 %v3002_v19, %s2240_s10 }
 0x3f3   : > { %v1335_v52 = vpop.permute.xlu1 %1334  ;;  %v1373_v63 = vpop.permute.xlu0 %1372 }
 0x3f5   : > { %1586 = vrot.lane.b32.xlu1 %v3010_v30, %s2240_s10  ;;  %1592 = vrot.lane.b32.xlu0 %v3004_v27, %s2240_s10 }
 0x3f7   : > { %v1375_v58 = vpop.permute.xlu1 %1374  ;;  %v1413_v32 = vpop.permute.xlu0 %1412 }
 0x3f9   : > { %1594 = vrot.lane.b32.xlu1 %v3012_v62, %s2240_s10 }
 0x3fb   : > { %v1415_v53 = vpop.permute.xlu1 %1414  ;;  %v1461_v29 = vpop.permute.xlu0 %1460 }
 0x3ff   : > { %v1463_v57 = vpop.permute.xlu1 %1462  ;;  %v1301_v50 = vpop.permute.xlu0 %1300 }
 0x400   : > { %v1308_v42 = vsel %vm292_vm2, %v1293_v25, %v1301_v50  ;;  %v1312_v49 = vsel %vm292_vm2, %v1301_v50, %v1293_v25 }
 0x401   : > { %v1316_v47 = vmul.f32 %v1312_v49, %v2365_v16  ;;  %v1317_v3 = vmul.f32 %v1308_v42, %v2368_v17 }
 0x403   : > { %v1303_v39 = vpop.permute.xlu1 %1302  ;;  %v1341_v11 = vpop.permute.xlu0 %1340 }
 0x404   : > { %v1309_v41 = vsel %vm292_vm2, %v1295_v54, %v1303_v39  ;;  %v1313_v20 = vsel %vm292_vm2, %v1303_v39, %v1295_v54  ;;  %v1348_v21 = vsel %vm311_vm1, %v1333_v43, %v1341_v11  ;;  %v1352_v26 = vsel %vm311_vm1, %v1341_v11, %v1333_v43 }
 0x405   : > { %v1318_v18 = vmul.f32 %v1313_v20, %v2365_v16  ;;  %v1319_v10 = vmul.f32 %v1309_v41, %v2368_v17  ;;  %v3152_v5 = vmul.f32 %v1352_v26, %v2359_v14  ;;  %v3155_v40 = vmul.f32 %v1348_v21, %v2362_v15 }
 0x407   : > { %v1343_v4 = vpop.permute.xlu1 %1342  ;;  %v1381_v23 = vpop.permute.xlu0 %1380  ;;  %v2076_v48 = vpack.c.bf16 %v1319_v10, %v1317_v3  ;;  %v2078_v33 = vpack.c.bf16 %v1318_v18, %v1316_v47 }
 0x408   : > { %v1349_v13 = vsel %vm311_vm1, %v1335_v52, %v1343_v4  ;;  %v1353_v56 = vsel %vm311_vm1, %v1343_v4, %v1335_v52  ;;  %v1388_v2 = vsel %vm330_vm3, %v1373_v63, %v1381_v23  ;;  %v1392_v51 = vsel %vm330_vm3, %v1381_v23, %v1373_v63 }
 0x409   : > { %v3166_v0 = vmul.f32 %v1353_v56, %v2359_v14  ;;  %v3169_v34 = vmul.f32 %v1349_v13, %v2362_v15  ;;  %v3172_v59 = vmul.f32 %v1392_v51, %v2388_v35  ;;  %v3175_v1 = vmul.f32 %v1388_v2, %v2391_v36  ;;  %2077 = vmatprep.subr.bf16.mxu0 %v2076_v48 }
 0x40a   : > { %2079 = vmatpush1.bf16.msra.mxu0 %v2078_v33 }
 0x40b   : > { %v1383_v22 = vpop.permute.xlu1 %1382  ;;  %v1421_v44 = vpop.permute.xlu0 %1420 }
 0x40c   : > { %v1389_v25 = vsel %vm330_vm3, %v1375_v58, %v1383_v22  ;;  %v1393_v28 = vsel %vm330_vm3, %v1383_v22, %v1375_v58  ;;  %v1428_v54 = vsel %vm349_vm4, %v1413_v32, %v1421_v44  ;;  %v1432_v43 = vsel %vm349_vm4, %v1421_v44, %v1413_v32 }
 0x40d   : > { %v3186_v52 = vmul.f32 %v1393_v28, %v2388_v35  ;;  %v3189_v63 = vmul.f32 %v1389_v25, %v2391_v36  ;;  %v3192_v50 = vmul.f32 %v1432_v43, %v2394_v37  ;;  %v3195_v42 = vmul.f32 %v1428_v54, %v2397_v38 }
 0x40f   : > { %1406 = vst [vmem:[#allocation2 + $0x90] sm:$0xff] %v3186_v52  ;;  %1407 = vst [vmem:[#allocation2 + $0x98] sm:$0xff] %v3189_v63  ;;  %v1423_v58 = vpop.permute.xlu1 %1422  ;;  %v1469_v49 = vpop.permute.xlu0 %1468 }
 0x410   : > { %v1429_v32 = vsel %vm349_vm4, %v1415_v53, %v1423_v58  ;;  %v1433_v47 = vsel %vm349_vm4, %v1423_v58, %v1415_v53  ;;  %v1476_v3 = vsel %vm370_vm5, %v1461_v29, %v1469_v49  ;;  %v1480_v39 = vsel %vm370_vm5, %v1469_v49, %v1461_v29 }
 0x411   : > { %v3208_v11 = vmul.f32 %v1433_v47, %v2394_v37  ;;  %v3211_v41 = vmul.f32 %v1429_v32, %v2397_v38  ;;  %v3214_v20 = vmul.f32 %v1476_v3, %v2409_v45  ;;  %v3217_v21 = vmul.f32 %v1480_v39, %v2412_v46 }
 0x413   : > { %v1471_v26 = vpop.permute.xlu1 %1470  ;;  %v1297_v53 = vpop.permute.xlu0 %1296 }
 0x414   : > { %v1477_v18 = vsel %vm370_vm5, %v1463_v57, %v1471_v26  ;;  %v1481_v29 = vsel %vm370_vm5, %v1471_v26, %v1463_v57 }
 0x415   : > { %v3224_v10 = vmul.f32 %v1477_v18, %v2409_v45  ;;  %v3227_v4 = vmul.f32 %v1481_v29, %v2412_v46 }
 0x417   : > { %v1299_v23 = vpop.permute.xlu1 %1298  ;;  %v1337_v48 = vpop.permute.xlu0 %1336 }
 0x41b   : > { %v1339_v33 = vpop.permute.xlu1 %1338  ;;  %v1377_v13 = vpop.permute.xlu0 %1376 }
 0x41f   : > { %v1379_v56 = vpop.permute.xlu1 %1378  ;;  %v1417_v2 = vpop.permute.xlu0 %1416 }
 0x423   : > { %v3229_v51 = vpop.permute.xlu1 %1418  ;;  %v1465_v22 = vpop.permute.xlu0 %1464 }
 0x427   : > { %v3231_v44 = vpop.permute.xlu1 %1466  ;;  %v1305_v25 = vpop.permute.xlu0 %1304 }
 0x428   : > { %v1310_v57 = vsel %vm292_vm2, %v1297_v53, %v1305_v25  ;;  %v1314_v28 = vsel %vm292_vm2, %v1305_v25, %v1297_v53 }
 0x429   : > { %v1320_v54 = vmul.f32 %v1314_v28, %v2365_v16  ;;  %v1321_v43 = vmul.f32 %v1310_v57, %v2368_v17 }
 0x42b   : > { %v1307_v58 = vpop.permute.xlu1 %1306  ;;  %v3239_v49 = vpop.permute.xlu0 %1500 }
 0x42c   : > { %v1311_v32 = vsel %vm292_vm2, %v1299_v23, %v1307_v58  ;;  %v1315_v47 = vsel %vm292_vm2, %v1307_v58, %v1299_v23 }
 0x42d   : > { %v1322_v3 = vmul.f32 %v1315_v47, %v2365_v16  ;;  %v1323_v39 = vmul.f32 %v1311_v32, %v2368_v17  ;;  %v2084_v16 = vpack.c.bf16 %v3169_v34, %v3155_v40 }
 0x42f   : > { %v1503_v26 = vpop.permute.xlu1 %1502  ;;  %v1345_v18 = vpop.permute.xlu0 %1344  ;;  %v2080_v53 = vpack.c.bf16 %v1323_v39, %v1321_v43  ;;  %v2082_v29 = vpack.c.bf16 %v1322_v3, %v1320_v54  ;;  %v2086_v54 = vpack.c.bf16 %v3166_v0, %v3152_v5 }
 0x430   : > { %v1350_v25 = vsel %vm311_vm1, %v1337_v48, %v1345_v18  ;;  %v1354_v57 = vsel %vm311_vm1, %v1345_v18, %v1337_v48 }
 0x431   : > { %v1360_v28 = vmul.f32 %v1354_v57, %v2359_v14  ;;  %v1361_v55 = vmul.f32 %v1350_v25, %v2362_v15  ;;  %2081 = vmatprep.subr.bf16.mxu0 %v2080_v53  ;;  %v2094_v57 = vpack.c.bf16 %v3186_v52, %v3172_v59 }
 0x432   : > { %2083 = vmatpush1.bf16.msra.mxu0 %v2082_v29 }
 0x433   : > { %v1347_v17 = vpop.permute.xlu1 %1346  ;;  %v1385_v23 = vpop.permute.xlu0 %1384  ;;  %2085 = vmatprep.subr.bf16.mxu0 %v2084_v16 }
 0x434   : > { %v1351_v43 = vsel %vm311_vm1, %v1339_v33, %v1347_v17  ;;  %v1355_v48 = vsel %vm311_vm1, %v1347_v17, %v1339_v33  ;;  %v1390_v58 = vsel %vm330_vm3, %v1377_v13, %v1385_v23  ;;  %v1394_v32 = vsel %vm330_vm3, %v1385_v23, %v1377_v13 }
 0x435   : > { %v1362_v40 = vmul.f32 %v1355_v48, %v2359_v14  ;;  %v1363_v34 = vmul.f32 %v1351_v43, %v2362_v15  ;;  %v1400_v47 = vmul.f32 %v1394_v32, %v2388_v35  ;;  %v1401_v5 = vmul.f32 %v1390_v58, %v2391_v36 }
 0x436   : > { %2087 = vmatpush1.bf16.msra.mxu0 %v2086_v54  ;;  %v2092_v33 = vpack.c.bf16 %v3189_v63, %v3175_v1 }
 0x437   : > { %v1511_v0 = vpop.permute.xlu1 %1510  ;;  %v1425_v3 = vpop.permute.xlu0 %1424  ;;  %v2088_v39 = vpack.c.bf16 %v1363_v34, %v1361_v55  ;;  %v2090_v18 = vpack.c.bf16 %v1362_v40, %v1360_v28  ;;  %v2100_v40 = vpack.c.bf16 %v3211_v41, %v3195_v42 }
 0x438   : > { %v1517_v53 = vsel %vm389_vm6, %v1503_v26, %v1511_v0  ;;  %v1521_v14 = vsel %vm389_vm6, %v1511_v0, %v1503_v26  ;;  %v1430_v15 = vsel %vm349_vm4, %v1417_v2, %v1425_v3  ;;  %v1434_v13 = vsel %vm349_vm4, %v1425_v3, %v1417_v2 }
 0x439   : > { %v3280_v29 = vmul.f32 %v1517_v53, %v2430_v8  ;;  %v3283_v55 = vmul.f32 %v1521_v14, %v2433_v9  ;;  %v1440_v1 = vmul.f32 %v1434_v13, %v2394_v37  ;;  %v1441_v63 = vmul.f32 %v1430_v15, %v2397_v38  ;;  %2089 = vmatprep.subr.bf16.mxu0 %v2088_v39 }
 0x43a   : > { %2091 = vmatpush1.bf16.msra.mxu0 %v2090_v18  ;;  %v2102_v0 = vpack.c.bf16 %v3208_v11, %v3192_v50 }
 0x43b   : > { %v1387_v25 = vpop.permute.xlu1 %1386  ;;  %v1473_v26 = vpop.permute.xlu0 %1472  ;;  %2093 = vmatprep.subr.bf16.mxu0 %v2092_v33 }
 0x43c   : > { %v1391_v2 = vsel %vm330_vm3, %v1379_v56, %v1387_v25  ;;  %v1395_v28 = vsel %vm330_vm3, %v1387_v25, %v1379_v56  ;;  %v1478_v16 = vsel %vm370_vm5, %v1465_v22, %v1473_v26  ;;  %v1482_v17 = vsel %vm370_vm5, %v1473_v26, %v1465_v22 }
 0x43d   : > { %v1402_v23 = vmul.f32 %v1395_v28, %v2388_v35  ;;  %v1403_v54 = vmul.f32 %v1391_v2, %v2391_v36  ;;  %v3300_v43 = vmul.f32 %v1478_v16, %v2409_v45  ;;  %v3303_v59 = vmul.f32 %v1482_v17, %v2412_v46 }
 0x43e   : > { %2095 = vmatpush1.bf16.msra.mxu0 %v2094_v57 }
 0x43f   : > { %v3305_v52 = vpop.permute.xlu1 %1506  ;;  %v1509_v56 = vpop.permute.xlu0 %1508  ;;  %v2096_v48 = vpack.c.bf16 %v1403_v54, %v1401_v5  ;;  %v2098_v58 = vpack.c.bf16 %v1402_v23, %v1400_v47 }
 0x440   : > { %v1516_v22 = vsel %vm389_vm6, %v3239_v49, %v1509_v56  ;;  %v1520_v35 = vsel %vm389_vm6, %v1509_v56, %v3239_v49 }
 0x441   : > { %v3314_v36 = vmul.f32 %v1516_v22, %v2430_v8  ;;  %v3317_v32 = vmul.f32 %v1520_v35, %v2433_v9  ;;  %2097 = vmatprep.subr.bf16.mxu0 %v2096_v48 }
 0x442   : > { %2099 = vmatpush1.bf16.msra.mxu0 %v2098_v58 }
 0x443   : > { %v1427_v34 = vpop.permute.xlu1 %1426  ;;  %v1505_v47 = vpop.permute.xlu0 %1504  ;;  %2101 = vmatprep.subr.bf16.mxu0 %v2100_v40  ;;  %v2126_v35 = vpack.c.bf16 %v3280_v29, %v3314_v36 }
 0x444   : > { %v1431_v5 = vsel %vm349_vm4, %v3229_v51, %v1427_v34  ;;  %v1435_v49 = vsel %vm349_vm4, %v1427_v34, %v3229_v51 }
 0x445   : > { %v1442_v3 = vmul.f32 %v1435_v49, %v2394_v37  ;;  %v1443_v39 = vmul.f32 %v1431_v5, %v2397_v38  ;;  %v2108_v37 = vpack.c.bf16 %v2996_v60, %v2990_v31  ;;  %v2112_v31 = vpack.c.bf16 %v3012_v62, %v3004_v27 }
 0x446   : > { %2103 = vmatpush1.bf16.msra.mxu0 %v2102_v0  ;;  %v2116_v27 = vpack.c.bf16 %v3227_v4, %v3217_v21 }
 0x447   : > { %v1543_v42 = vpop.permute.xlu1 %1542  ;;  %v1513_v41 = vpop.permute.xlu0 %1512  ;;  %v2104_v18 = vpack.c.bf16 %v1443_v39, %v1441_v63  ;;  %v2106_v33 = vpack.c.bf16 %v1442_v3, %v1440_v1  ;;  %v2110_v1 = vpack.c.bf16 %v2994_v61, %v2988_v24  ;;  %v2114_v24 = vpack.c.bf16 %v3010_v30, %v3002_v19  ;;  %v2222_v3 = vld [vmem:[%s3446_s2 + $0x18] ss:$0 sm:$0xff] }
 0x448   : > { %v1518_v53 = vsel %vm389_vm6, %v1505_v47, %v1513_v41  ;;  %v1522_v14 = vsel %vm389_vm6, %v1513_v41, %v1505_v47  ;;  %v2118_v19 = vpack.c.bf16 %v3224_v10, %v3214_v20 }
 0x449   : > { %v3336_v51 = vmul.f32 %v1518_v53, %v2430_v8  ;;  %v3339_v50 = vmul.f32 %v1522_v14, %v2433_v9  ;;  %2105 = vmatprep.subr.bf16.mxu0 %v2104_v18 }
 0x44a   : > { %2107 = vmatpush1.bf16.msra.mxu0 %v2106_v33 }
 0x44b   : > { %v1551_v38 = vpop.permute.xlu1 %1550  ;;  %v1541_v11 = vpop.permute.xlu0 %1540  ;;  %2109 = vmatprep.subr.bf16.mxu0 %v2108_v37 }
 0x44c   : > { %v1557_v15 = vsel %vm408_vm7, %v1543_v42, %v1551_v38  ;;  %v1561_v13 = vsel %vm408_vm7, %v1551_v38, %v1543_v42 }
 0x44d   : > { %v3350_v63 = vmul.f32 %v1557_v15, %v2437_v6  ;;  %v1567_v25 = vmul.f32 %v1561_v13, %v2440_v12 }
 0x44e   : > { %2111 = vmatpush1.bf16.msra.mxu0 %v2110_v1 }
 0x44f   : > { %v1547_v60 = vpop.permute.xlu1 %1546  ;;  %v1549_v26 = vpop.permute.xlu0 %1548  ;;  %2113 = vmatprep.subr.bf16.mxu0 %v2112_v31 }
 0x450   : > { %v1556_v57 = vsel %vm408_vm7, %v1541_v11, %v1549_v26  ;;  %v1560_v2 = vsel %vm408_vm7, %v1549_v26, %v1541_v11 }
 0x451   : > { %v1564_v61 = vmul.f32 %v1556_v57, %v2437_v6  ;;  %v1565_v28 = vmul.f32 %v1560_v2, %v2440_v12 }
 0x452   : > { %2115 = vmatpush1.bf16.msra.mxu0 %v2114_v24 }
 0x453   : > { %v1475_v62 = vpop.permute.xlu1 %1474  ;;  %v1545_v16 = vpop.permute.xlu0 %1544  ;;  %2117 = vmatprep.subr.bf16.mxu0 %v2116_v27  ;;  %v2132_v49 = vpack.c.bf16 %v1567_v25, %v1565_v28  ;;  %v3483_v28 = vmov 0.0  }
 0x454   : > { %v1479_v17 = vsel %vm370_vm5, %v3231_v44, %v1475_v62  ;;  %v1483_v23 = vsel %vm370_vm5, %v1475_v62, %v3231_v44 }
 0x455   : > { %v1490_v30 = vmul.f32 %v1479_v17, %v2409_v45  ;;  %v1491_v54 = vmul.f32 %v1483_v23, %v2412_v46  ;;  %v2124_v45 = vpack.c.bf16 %v3283_v55, %v3317_v32  ;;  %v1697_v17 = vld [vmem:[#allocation2 + $0x240] sm:$0x1] }
 0x456   : > { %2119 = vmatpush1.bf16.msra.mxu0 %v2118_v19 }
 0x457   : > { %v1583_v21 = vpop.permute.xlu1 %1582  ;;  %v1553_v4 = vpop.permute.xlu0 %1552  ;;  %v2120_v56 = vpack.c.bf16 %v1491_v54, %v3303_v59  ;;  %v2122_v48 = vpack.c.bf16 %v1490_v30, %v3300_v43 }
 0x458   : > { %v1558_v58 = vsel %vm408_vm7, %v1545_v16, %v1553_v4  ;;  %v1562_v44 = vsel %vm408_vm7, %v1553_v4, %v1545_v16  ;;  %v1698_v16 = vld [vmem:[#allocation2 + $0x248] sm:$0x1] }
 0x459   : > { %v1568_v22 = vmul.f32 %v1558_v58, %v2437_v6  ;;  %v1569_v20 = vmul.f32 %v1562_v44, %v2440_v12  ;;  %2121 = vmatprep.subr.bf16.mxu0 %v2120_v56 }
 0x45a   : > { %2123 = vmatpush1.bf16.msra.mxu0 %v2122_v48 }
 0x45b   : > { %v1515_v46 = vpop.permute.xlu1 %1514  ;;  %v1581_v10 = vpop.permute.xlu0 %1580  ;;  %2125 = vmatprep.subr.bf16.mxu0 %v2124_v45 }
 0x45c   : > { %v1519_v43 = vsel %vm389_vm6, %v3305_v52, %v1515_v46  ;;  %v1523_v59 = vsel %vm389_vm6, %v1515_v46, %v3305_v52 }
 0x45d   : > { %v1530_v40 = vmul.f32 %v1519_v43, %v2430_v8  ;;  %v1531_v34 = vmul.f32 %v1523_v59, %v2433_v9  ;;  %v2221_v9 = vld [vmem:[%s3446_s2 + $0x10] ss:$0 sm:$0xff] }
 0x45e   : > { %2127 = vmatpush1.bf16.msra.mxu0 %v2126_v35 }
 0x45f   : > { %v1591_v55 = vpop.permute.xlu1 %1590  ;;  %v1589_v32 = vpop.permute.xlu0 %1588  ;;  %v2128_v47 = vpack.c.bf16 %v1531_v34, %v3339_v50  ;;  %v2130_v5 = vpack.c.bf16 %v1530_v40, %v3336_v51  ;;  %v2134_v51 = vpack.c.bf16 %v3350_v63, %v1564_v61 }
 0x460   : > { %v1597_v0 = vsel %vm427_vm8, %v1583_v21, %v1591_v55  ;;  %v1601_v52 = vsel %vm427_vm8, %v1591_v55, %v1583_v21  ;;  %v1596_v29 = vsel %vm427_vm8, %v1581_v10, %v1589_v32  ;;  %v1600_v8 = vsel %vm427_vm8, %v1589_v32, %v1581_v10 }
 0x461   : > { %v1606_v36 = vmul.f32 %v2221_v9, %v1597_v0  ;;  %v1607_v39 = vmul.f32 %v2222_v3, %v1601_v52  ;;  %v1604_v42 = vmul.f32 %v2221_v9, %v1596_v29  ;;  %v1605_v41 = vmul.f32 %v2222_v3, %v1600_v8  ;;  %2129 = vmatprep.subr.bf16.mxu0 %v2128_v47 }
 0x462   : > { %2131 = vmatpush1.bf16.msra.mxu0 %v2130_v5 }
 0x463   : > { %v1555_v18 = vpop.permute.xlu1 %1554  ;;  %v1585_v33 = vpop.permute.xlu0 %1584  ;;  %2133 = vmatprep.subr.bf16.mxu0 %v2132_v49  ;;  %v2142_v2 = vpack.c.bf16 %v1606_v36, %v1604_v42 }
 0x464   : > { %v1559_v53 = vsel %vm408_vm7, %v1547_v60, %v1555_v18  ;;  %v1563_v14 = vsel %vm408_vm7, %v1555_v18, %v1547_v60  ;;  %v2140_v60 = vpack.c.bf16 %v1607_v39, %v1605_v41 }
 0x465   : > { %v1570_v50 = vmul.f32 %v1559_v53, %v2437_v6  ;;  %v1571_v37 = vmul.f32 %v1563_v14, %v2440_v12  ;;  %v1622_v6 = vld [vmem:[%s3449_s5] sm:$0xff] }
 0x466   : > { %2135 = vmatpush1.bf16.msra.mxu0 %v2134_v51 }
 0x467   : > { %v1587_v38 = vpop.permute.xlu1 %1586  ;;  %v1593_v11 = vpop.permute.xlu0 %1592  ;;  %v2136_v15 = vpack.c.bf16 %v1571_v37, %v1569_v20  ;;  %v2138_v13 = vpack.c.bf16 %v1570_v50, %v1568_v22 }
 0x468   : > { %v1598_v1 = vsel %vm427_vm8, %v1585_v33, %v1593_v11  ;;  %v1602_v25 = vsel %vm427_vm8, %v1593_v11, %v1585_v33 }
 0x469   : > { %v1608_v31 = vmul.f32 %v2221_v9, %v1598_v1  ;;  %v1609_v26 = vmul.f32 %v2222_v3, %v1602_v25  ;;  %2137 = vmatprep.subr.bf16.mxu0 %v2136_v15 }
 0x46a   : > { %2139 = vmatpush1.bf16.msra.mxu0 %v2138_v13 }
 0x46b   : > { %v1595_v12 = vpop.permute.xlu1 %1594  ;;  %2141 = vmatprep.subr.bf16.mxu0 %v2140_v60 }
 0x46c   : > { %v1599_v63 = vsel %vm427_vm8, %v1587_v38, %v1595_v12  ;;  %v1603_v57 = vsel %vm427_vm8, %v1595_v12, %v1587_v38 }
 0x46d   : > { %v1610_v24 = vmul.f32 %v2221_v9, %v1599_v63  ;;  %v1611_v61 = vmul.f32 %v2222_v3, %v1603_v57  ;;  %1773 = vmatmul.mubr.f32.vlgmr.msra.gmra.mrb[8].mxu0 %v1622_v6 }
 0x46e   : > { %2143 = vmatpush1.bf16.msra.mxu0 %v2142_v2  ;;  %1843 = vmatprep.mubr.f32.mxu0 %v3483_v28 }
 0x46f   : > { %v2144_v27 = vpack.c.bf16 %v1611_v61, %v1609_v26  ;;  %v2146_v62 = vpack.c.bf16 %v1610_v24, %v1608_v31 }
 0x471   : > { %2145 = vmatprep.subr.bf16.mxu0 %v2144_v27 }
 0x472   : > { %2147 = vmatpush1.bf16.msra.mxu0 %v2146_v62 }
 0x473   : > { %1972 = vmatprep.subr.msk.mxu0 %vm486_vm9, %v1698_v16 }
 0x476   : > { %1973 = vmatpush1.msk.msra.mxu0 %vm486_vm9, %v1697_v17 }
 0x477   : > { %1974 = vmatmul.mubr.msk.f32.vlgmr.msra.gmra.mrb[8].mxu0 %vm1047_vm0, %v1624_v7 }
 0x54a   : > { %v1845_v23 = vpop.f32.mrb[8].mxu0 }
 0x54b   : > { %v1852_v19 = vmin.f32 %v1845_v23, 0.0  ;;  %v1847_v30 = vpop.f32.mrb[9].mxu0  ;;  %vm1850_vm1 = vcmp.gt.f32.partialorder %v1845_v23, 0.0 }
 0x54c   : > { %v1853_v54 = vmin.f32 %v1847_v30, 0.0  ;;  %vm1851_vm2 = vcmp.gt.f32.partialorder %v1847_v30, 0.0 }
 0x54d   : > { %v1854_v21 = vmul.f32 1.442695, %v1852_v19 }
 0x54e   : > { %v1856_v4 = vmul.f32 1.442695, %v1853_v54 }
 0x54f   : > { %2217 = vpow2.f32 %v1854_v21 }
 0x550   : > { %2219 = vpow2.f32 %v1856_v4 }
 0x559   : > { %v2218_v56 = vpop.eup %2217 }
 0x55a   : > { %v2220_v48 = vpop.eup %2219  ;;  %v1975_v58 = vadd.f32 -1.0, %v2218_v56 }
 0x55b   : > { %v1976_v44 = vadd.f32 -1.0, %v2220_v48 }
 0x55c   : > { %v1860_v22 = vsel %vm1850_vm1, %v1845_v23, %v1975_v58 }
 0x55d   : > { %v1861_v20 = vsel %vm1851_vm2, %v1847_v30, %v1976_v44  ;;  %1862 = vst [vmem:[%s271_s20] sm:$0xff] %v1860_v22 }
 0x55e   : > { %1863 = vst [vmem:[%s271_s20 + $0x8] sm:$0xff] %v1861_v20 }
 0x55f PF: > { %s16_s21 = sadd.s32 1, %s2229_s21  }
 0x560   : > { %p13_p4 = scmp.ge.s32.totalorder %s16_s21, 4  }
 0x562   :  { %15 = sbr.rel (!%p13_p4) target bundleno = 1 (0x1), region = 79 }

</bundles_post_ra>
